<compile_context>
chip_gen: v5e
topology: v5e:2x2
jax: 0.10.0
libtpu: 0.0.40
codegen_flags: <defaults>
</compile_context>

<pallas_src>
import functools

import jax
import jax.numpy as jnp
from jax import lax
from jax.experimental import pallas as pl
from jax.experimental.pallas import tpu as pltpu


def _round_up(x, m):
    return (x + m - 1) // m * m


def _bottleneck_kernel(x_ref, w1_ref, s1_ref, b1_ref,
                       w2_ref, s2_ref, b2_ref,
                       w3_ref, s3_ref, b3_ref,
                       o_ref, pad_ref, *, fuse_k9):
    # x_ref:   (Bt, H, W, Cin)           input activations (f32 or bf16)
    # w1_ref:  (Cin, P)          bf16    1x1 conv
    # w2_ref:  (9P, P)   bf16 if fuse_k9 3x3 conv, K index = (dy*3+dx)*P + cin
    #          (3, 3P, P) bf16 otherwise rows = dy, K index = dx*P + cin
    # w3_ref:  (P, 4P)           bf16    1x1 conv
    # sK/bK:   (1, Ck)           f32     folded BN scale / bias
    # o_ref:   (Bt, H, W, 4P)
    # pad_ref: (Bt, H+2, Wp8, P) bf16    zero-padded conv1 output
    Bt, H, W, Cin = x_ref.shape
    P = w1_ref.shape[1]
    Cout = w3_ref.shape[1]
    Wp8 = pad_ref.shape[2]
    M = Bt * H * W

    x = x_ref[...]                                   # (Bt, H, W, Cin)
    xm = x.reshape(M, Cin)

    # ---- conv1 (1x1) + bn1 + relu  (bf16 MXU operands, f32 accumulate) ----
    o1 = jnp.dot(xm.astype(jnp.bfloat16), w1_ref[...],
                 preferred_element_type=jnp.float32)
    o1 = jnp.maximum(o1 * s1_ref[...] + b1_ref[...], 0.0)       # (M, P) f32
    o1b = o1.astype(jnp.bfloat16).reshape(Bt, H, W, P)

    # ---- zero-padded o1 in bf16 scratch ----
    # Halo rows and interior rows are full-width (aligned) stores on the
    # outer dims; the alignment tail beyond column W+1 is written but never
    # read, so no stale scratch can leak between grid steps.
    zrow = jnp.zeros((Bt, 1, Wp8, P), jnp.bfloat16)
    zcol = jnp.zeros((Bt, H, 1, P), jnp.bfloat16)
    parts = [zcol, o1b, zcol]
    if Wp8 > W + 2:
        parts.append(jnp.zeros((Bt, H, Wp8 - (W + 2), P), jnp.bfloat16))
    pad_ref[:, 0:1, :, :] = zrow
    pad_ref[:, H + 1:H + 2, :, :] = zrow
    pad_ref[:, 1:H + 1, :, :] = jnp.concatenate(parts, axis=2)

    # ---- conv2 (3x3, stride 1, pad 1) + bn2 + relu ----
    # dx-im2col hoisted: the 3 sublane-shifted slices are built exactly once.
    rows = pad_ref[...]                               # (Bt, H+2, Wp8, P) bf16
    dxbuf = jnp.concatenate([rows[:, :, dx:dx + W, :] for dx in range(3)],
                            axis=3)                   # (Bt, H+2, W, 3P) bf16

    if fuse_k9:
        # Single K = 9P matmul (fills the 256-deep MXU on v6e/v7x, P <= 128).
        patches = jnp.concatenate([dxbuf[:, dy:dy + H] for dy in range(3)],
                                  axis=3)             # (Bt, H, W, 9P) bf16
        o2acc = jnp.dot(patches.reshape(M, 9 * P), w2_ref[...],
                        preferred_element_type=jnp.float32)
    else:
        # 3 matmuls with K = 3P, accumulated as a value (no scratch RMW).
        o2acc = jnp.dot(dxbuf[:, 0:H].reshape(M, 3 * P), w2_ref[0],
                        preferred_element_type=jnp.float32)
        for dy in range(1, 3):
            o2acc = o2acc + jnp.dot(dxbuf[:, dy:dy + H].reshape(M, 3 * P),
                                    w2_ref[dy],
                                    preferred_element_type=jnp.float32)
    o2 = jnp.maximum(o2acc * s2_ref[...] + b2_ref[...], 0.0)    # (M, P) f32

    # ---- conv3 (1x1) + bn3 ----
    o3 = jnp.dot(o2.astype(jnp.bfloat16), w3_ref[...],
                 preferred_element_type=jnp.float32)
    o3 = o3 * s3_ref[...] + b3_ref[...]                         # (M, 4P) f32

    # ---- residual add (f32) + relu  (Cin == 4P, no downsample) ----
    out = jnp.maximum(o3 + xm.astype(jnp.float32), 0.0)
    o_ref[...] = out.reshape(Bt, H, W, Cout).astype(o_ref.dtype)


def _vmem_cap_bytes():
    """Generation-aware VMEM ceiling (v5e/v6e: 128 MiB; v7x: 64 MiB/TC)."""
    try:
        kind = jax.devices()[0].device_kind.lower()
    except Exception:
        kind = ""
    if ("v5" in kind) or ("v6" in kind):
        return 100 * 1024 * 1024
    return 56 * 1024 * 1024          # v7x / unknown: stay well under 64 MiB


def bottleneck_pallas_nhwc(x_nhwc, params, *, block_batch=None, fuse_k9=None):
    """NHWC-native entry point. x_nhwc: (N, H, W, Cin) -> (N, H, W, 4P).

    Works for f32 or bf16 activations (output dtype == input dtype); BN,
    accumulation and the residual add are always f32 inside the kernel.
    """
    (w1, s1, b1, w2, s2, b2, w3, s3, b3) = params
    N, H, W, Cin = x_nhwc.shape
    P = w1.shape[1]
    Cout = w3.shape[1]
    assert Cout == Cin, "stride=1 / downsample=None requires Cin == 4*planes"
    assert W % 8 == 0, "keep W a multiple of 8 so (..,H,W,C)->(M,C) is cheap"

    if fuse_k9 is None:
        fuse_k9 = P <= 128       # K = 9P fills the 256-deep MXU on v6e/v7x

    # bf16 MXU weights (halves weight DMA); BN scale/bias stay f32.
    w1b = w1.astype(jnp.bfloat16)
    if fuse_k9:
        w2b = w2.reshape(9 * P, P).astype(jnp.bfloat16)     # K = (dy*3+dx)*P+ci
    else:
        w2b = w2.reshape(3, 3 * P, P).astype(jnp.bfloat16)  # K = dx*P + ci
    w3b = w3.astype(jnp.bfloat16)

    xbytes = x_nhwc.dtype.itemsize
    Wp8 = _round_up(W + 2, 8)

    w_bytes = (w1b.size + w2b.size + w3b.size) * 2 \
        + (s1.size + b1.size + s2.size + b2.size + s3.size + b3.size) * 4

    # Per-image working set: double-buffered in/out blocks + bf16 pad scratch
    # + transient bf16 im2col values + f32 intermediates.
    per_img = (2 * H * W * (Cin + Cout) * xbytes
               + (H + 2) * Wp8 * P * 2
               + (H + 2) * W * 3 * P * 2 + H * W * 9 * P * 2
               + H * W * (Cin + 6 * P) * 4)

    # Several images per grid step amortize the ~0.35us/step overhead at small
    # spatial sizes; keep >= 2 grid steps so v7x's two TensorCores both work.
    if block_batch is None:
        budget = 24 * 1024 * 1024
        block_batch = 1
        for cand in range(1, N + 1):
            if N % cand:
                continue
            if N >= 2 and N // cand < 2:
                continue
            if cand * per_img <= budget:
                block_batch = cand
    Bt = block_batch
    assert N % Bt == 0

    # Advisory cost estimate for the XLA scheduler.
    flops = 2 * N * H * W * (Cin * P + 9 * P * P + P * Cout)
    bytes_accessed = N * H * W * (Cin + Cout) * xbytes + w_bytes
    cost = pl.CostEstimate(flops=flops, transcendentals=0,
                           bytes_accessed=bytes_accessed)

    need = Bt * per_img + 2 * w_bytes            # weights are double-buffered
    vmem_limit = int(min(_vmem_cap_bytes(), max(32 * 1024 * 1024, 2 * need)))

    full = lambda a: pl.BlockSpec(a.shape, lambda n: (0,) * a.ndim)
    kernel = functools.partial(_bottleneck_kernel, fuse_k9=fuse_k9)

    out = pl.pallas_call(
        kernel,
        out_shape=jax.ShapeDtypeStruct((N, H, W, Cout), x_nhwc.dtype),
        grid_spec=pltpu.PrefetchScalarGridSpec(
            num_scalar_prefetch=0,
            grid=(N // Bt,),
            in_specs=[
                pl.BlockSpec((Bt, H, W, Cin), lambda n: (n, 0, 0, 0)),
                full(w1b), full(s1), full(b1),
                full(w2b), full(s2), full(b2),
                full(w3b), full(s3), full(b3),
            ],
            out_specs=pl.BlockSpec((Bt, H, W, Cout), lambda n: (n, 0, 0, 0)),
            scratch_shapes=[
                pltpu.VMEM((Bt, H + 2, Wp8, P), jnp.bfloat16),
            ],
        ),
        compiler_params=pltpu.CompilerParams(
            dimension_semantics=("parallel",),    # batch groups independent
            vmem_limit_bytes=vmem_limit),
        cost_estimate=cost,
    )(x_nhwc, w1b, s1, b1, w2b, s2, b2, w3b, s3, b3)
    return out


def bottleneck_pallas(x_nchw, params):
    """NCHW wrapper matching the PyTorch module interface (transposes are glue;
    prefer bottleneck_pallas_nhwc to avoid the extra HBM round trips)."""
    x_nhwc = jnp.transpose(x_nchw, (0, 2, 3, 1))
    out_nhwc = bottleneck_pallas_nhwc(x_nhwc, params)
    return jnp.transpose(out_nhwc, (0, 3, 1, 2))


def bottleneck_ref_nhwc(x, params):
    """Pure-JAX NHWC reference, inference-mode BN."""
    (w1, s1, b1, w2, s2, b2, w3, s3, b3) = params
    o = jnp.einsum('nhwc,cp->nhwp', x, w1)
    o = jnp.maximum(o * s1 + b1, 0.0)
    o = lax.conv_general_dilated(
        o, w2, window_strides=(1, 1), padding='SAME',
        dimension_numbers=('NHWC', 'HWIO', 'NHWC'))
    o = jnp.maximum(o * s2 + b2, 0.0)
    o = jnp.einsum('nhwc,cp->nhwp', o, w3)
    o = o * s3 + b3
    return jnp.maximum(o + x, 0.0)


def make_params(key, inplanes, planes):
    """Deterministic synthetic weights + folded BN params (eps=1e-5)."""
    expansion = 4
    eps = 1e-5
    ks = jax.random.split(key, 12)

    def fold_bn(c, k0, k1):
        gamma = 1.0 + 0.1 * jax.random.normal(k0, (c,), jnp.float32)
        beta = 0.1 * jax.random.normal(k1, (c,), jnp.float32)
        mean = 0.05 * jax.random.normal(jax.random.fold_in(k0, 7), (c,), jnp.float32)
        var = jnp.abs(1.0 + 0.1 * jax.random.normal(jax.random.fold_in(k1, 7), (c,), jnp.float32))
        scale = gamma * lax.rsqrt(var + eps)
        bias = beta - mean * scale
        return scale.reshape(1, c), bias.reshape(1, c)

    w1 = 0.1 * jax.random.normal(ks[0], (inplanes, planes), jnp.float32)           # Cin -> P
    w2 = 0.1 * jax.random.normal(ks[1], (3, 3, planes, planes), jnp.float32)        # HWIO
    w3 = 0.1 * jax.random.normal(ks[2], (planes, planes * expansion), jnp.float32)  # P -> 4P
    s1, b1 = fold_bn(planes, ks[3], ks[4])
    s2, b2 = fold_bn(planes, ks[5], ks[6])
    s3, b3 = fold_bn(planes * expansion, ks[7], ks[8])
    return (w1, s1, b1, w2, s2, b2, w3, s3, b3)


if __name__ == "__main__":
    key = jax.random.PRNGKey(0)
    k_x, k_p = jax.random.split(key)

    # Small shapes consistent with the module: inplanes = planes * expansion
    planes, H, W = 4, 16, 16
    inplanes = planes * 4   # 16
    params = make_params(k_p, inplanes, planes)

    # Case 1: N=2, NHWC-native, fused K=9P conv2 path (Bt auto -> 1).
    x2 = jax.random.normal(k_x, (2, H, W, inplanes), jnp.float32)
    out2 = jax.block_until_ready(bottleneck_pallas_nhwc(x2, params))
    ref2 = bottleneck_ref_nhwc(x2, params)
    assert out2.shape == (2, H, W, inplanes)
    # bf16 MXU operands with f32 accumulation -> relaxed tolerance
    assert jnp.allclose(out2, ref2, rtol=5e-2, atol=5e-2), (
        float(jnp.max(jnp.abs(out2 - ref2))))

    # Case 2: N=4 exercises the multi-image grid step (Bt=2) and the
    # 3-matmul (K=3P) conv2 path.
    x4 = jax.random.normal(jax.random.fold_in(k_x, 1), (4, H, W, inplanes),
                           jnp.float32)
    out4 = jax.block_until_ready(bottleneck_pallas_nhwc(x4, params,
                                                        fuse_k9=False))
    ref4 = bottleneck_ref_nhwc(x4, params)
    assert jnp.allclose(out4, ref4, rtol=5e-2, atol=5e-2), (
        float(jnp.max(jnp.abs(out4 - ref4))))

    # Case 3: NCHW wrapper matching the PyTorch module interface.
    x_nchw = jnp.transpose(x2, (0, 3, 1, 2))
    out_nchw = jax.block_until_ready(bottleneck_pallas(x_nchw, params))
    ref_nchw = jnp.transpose(ref2, (0, 3, 1, 2))
    assert out_nchw.shape == (2, inplanes, H, W)
    assert jnp.allclose(out_nchw, ref_nchw, rtol=5e-2, atol=5e-2), (
        float(jnp.max(jnp.abs(out_nchw - ref_nchw))))

    print("KERNEL_OK")
</pallas_src>

<mosaic_0001>
module attributes {stable_mosaic.version = 11 : i64} {
  func.func @_bottleneck_kernel(%arg0: i32, %arg1: memref<1x16x16x16xf32, #tpu.memory_space<vmem>>, %arg2: memref<16x4xbf16, #tpu.memory_space<vmem>>, %arg3: memref<1x4xf32, #tpu.memory_space<vmem>>, %arg4: memref<1x4xf32, #tpu.memory_space<vmem>>, %arg5: memref<36x4xbf16, #tpu.memory_space<vmem>>, %arg6: memref<1x4xf32, #tpu.memory_space<vmem>>, %arg7: memref<1x4xf32, #tpu.memory_space<vmem>>, %arg8: memref<4x16xbf16, #tpu.memory_space<vmem>>, %arg9: memref<1x16xf32, #tpu.memory_space<vmem>>, %arg10: memref<1x16xf32, #tpu.memory_space<vmem>>, %arg11: memref<1x16x16x16xf32, #tpu.memory_space<vmem>>, %arg12: memref<1x18x24x4xbf16, #tpu.memory_space<vmem>>) attributes {dimension_semantics = [#tpu.dimension_semantics<parallel>], iteration_bounds = array<i64: 2>, scalar_prefetch = 0 : i64, scratch_operands = 1 : i64, tpu.core_type = #tpu.core_type<tc>, window_params = [{transform_indices = @transform_0, window_bounds = array<i64: 1, 16, 16, 16>}, {pipeline_mode = #tpu.pipeline_mode<synchronous>, transform_indices = @transform_1, window_bounds = array<i64: 16, 4>}, {pipeline_mode = #tpu.pipeline_mode<synchronous>, transform_indices = @transform_2, window_bounds = array<i64: 1, 4>}, {pipeline_mode = #tpu.pipeline_mode<synchronous>, transform_indices = @transform_3, window_bounds = array<i64: 1, 4>}, {pipeline_mode = #tpu.pipeline_mode<synchronous>, transform_indices = @transform_4, window_bounds = array<i64: 36, 4>}, {pipeline_mode = #tpu.pipeline_mode<synchronous>, transform_indices = @transform_5, window_bounds = array<i64: 1, 4>}, {pipeline_mode = #tpu.pipeline_mode<synchronous>, transform_indices = @transform_6, window_bounds = array<i64: 1, 4>}, {pipeline_mode = #tpu.pipeline_mode<synchronous>, transform_indices = @transform_7, window_bounds = array<i64: 4, 16>}, {pipeline_mode = #tpu.pipeline_mode<synchronous>, transform_indices = @transform_8, window_bounds = array<i64: 1, 16>}, {pipeline_mode = #tpu.pipeline_mode<synchronous>, transform_indices = @transform_9, window_bounds = array<i64: 1, 16>}, {transform_indices = @transform_10, window_bounds = array<i64: 1, 16, 16, 16>}]} {
    %c0 = arith.constant 0 : index
    %c0_0 = arith.constant 0 : index
    %c0_1 = arith.constant 0 : index
    %c0_2 = arith.constant 0 : index
    %0 = vector.load %arg1[%c0, %c0_0, %c0_1, %c0_2] : memref<1x16x16x16xf32, #tpu.memory_space<vmem>>, vector<1x16x16x16xf32>
    %1 = vector.shape_cast %0 : vector<1x16x16x16xf32> to vector<256x16xf32>
    %2 = arith.truncf %1 : vector<256x16xf32> to vector<256x16xbf16>
    %c0_3 = arith.constant 0 : index
    %c0_4 = arith.constant 0 : index
    %3 = vector.load %arg2[%c0_3, %c0_4] : memref<16x4xbf16, #tpu.memory_space<vmem>>, vector<16x4xbf16>
    %cst = arith.constant dense<0.000000e+00> : vector<256x4xf32>
    %4 = tpu.matmul %2, %3, %cst {dimension_numbers = #tpu.dot_dimension_numbers<[1], [0], [0], [1], [0, 0, 1, 1], [], []>} : vector<256x16xbf16>, vector<16x4xbf16>, vector<256x4xf32> -> vector<256x4xf32>
    %c0_5 = arith.constant 0 : index
    %c0_6 = arith.constant 0 : index
    %5 = vector.load %arg3[%c0_5, %c0_6] : memref<1x4xf32, #tpu.memory_space<vmem>>, vector<1x4xf32>
    %6 = vector.broadcast %5 : vector<1x4xf32> to vector<256x4xf32>
    %7 = arith.mulf %4, %6 : vector<256x4xf32>
    %c0_7 = arith.constant 0 : index
    %c0_8 = arith.constant 0 : index
    %8 = vector.load %arg4[%c0_7, %c0_8] : memref<1x4xf32, #tpu.memory_space<vmem>>, vector<1x4xf32>
    %9 = vector.broadcast %8 : vector<1x4xf32> to vector<256x4xf32>
    %10 = arith.addf %7, %9 : vector<256x4xf32>
    %cst_9 = arith.constant 0.000000e+00 : f32
    %11 = vector.broadcast %cst_9 : f32 to vector<256x4xf32>
    %12 = arith.maximumf %10, %11 : vector<256x4xf32>
    %13 = arith.truncf %12 : vector<256x4xf32> to vector<256x4xbf16>
    %14 = vector.shape_cast %13 : vector<256x4xbf16> to vector<1x16x16x4xbf16>
    %cst_10 = arith.constant 0.000000e+00 : bf16
    %15 = vector.broadcast %cst_10 : bf16 to vector<1x1x24x4xbf16>
    %cst_11 = arith.constant 0.000000e+00 : bf16
    %16 = vector.broadcast %cst_11 : bf16 to vector<1x16x1x4xbf16>
    %cst_12 = arith.constant 0.000000e+00 : bf16
    %17 = vector.broadcast %cst_12 : bf16 to vector<1x16x6x4xbf16>
    %c0_13 = arith.constant 0 : index
    %c0_14 = arith.constant 0 : index
    %c0_15 = arith.constant 0 : index
    %c0_16 = arith.constant 0 : index
    %18 = vector.load %arg12[%c0_13, %c0_14, %c0_15, %c0_16] : memref<1x18x24x4xbf16, #tpu.memory_space<vmem>>, vector<1x1x24x4xbf16>
    tpu.vector_store %arg12[%c0_13, %c0_14, %c0_15, %c0_16], %15 {strides = array<i32>} : memref<1x18x24x4xbf16, #tpu.memory_space<vmem>>, vector<1x1x24x4xbf16>,
    %c0_17 = arith.constant 0 : index
    %c17 = arith.constant 17 : index
    %c0_18 = arith.constant 0 : index
    %c0_19 = arith.constant 0 : index
    %19 = vector.load %arg12[%c0_17, %c17, %c0_18, %c0_19] : memref<1x18x24x4xbf16, #tpu.memory_space<vmem>>, vector<1x1x24x4xbf16>
    tpu.vector_store %arg12[%c0_17, %c17, %c0_18, %c0_19], %15 {strides = array<i32>} : memref<1x18x24x4xbf16, #tpu.memory_space<vmem>>, vector<1x1x24x4xbf16>,
    %20 = tpu.concatenate %16, %14, %16, %17 in 2 : vector<1x16x1x4xbf16>, vector<1x16x16x4xbf16>, vector<1x16x1x4xbf16>, vector<1x16x6x4xbf16> -> vector<1x16x24x4xbf16>
    %c0_20 = arith.constant 0 : index
    %c1 = arith.constant 1 : index
    %c0_21 = arith.constant 0 : index
    %c0_22 = arith.constant 0 : index
    %21 = vector.load %arg12[%c0_20, %c1, %c0_21, %c0_22] : memref<1x18x24x4xbf16, #tpu.memory_space<vmem>>, vector<1x16x24x4xbf16>
    tpu.vector_store %arg12[%c0_20, %c1, %c0_21, %c0_22], %20 {strides = array<i32>} : memref<1x18x24x4xbf16, #tpu.memory_space<vmem>>, vector<1x16x24x4xbf16>,
    %c0_23 = arith.constant 0 : index
    %c0_24 = arith.constant 0 : index
    %c0_25 = arith.constant 0 : index
    %c0_26 = arith.constant 0 : index
    %22 = vector.load %arg12[%c0_23, %c0_24, %c0_25, %c0_26] : memref<1x18x24x4xbf16, #tpu.memory_space<vmem>>, vector<1x18x24x4xbf16>
    %23 = vector.extract_strided_slice %22 {offsets = [0, 0, 0, 0], sizes = [1, 18, 16, 4], strides = [1, 1, 1, 1]} : vector<1x18x24x4xbf16> to vector<1x18x16x4xbf16>
    %24 = vector.extract_strided_slice %22 {offsets = [0, 0, 1, 0], sizes = [1, 18, 16, 4], strides = [1, 1, 1, 1]} : vector<1x18x24x4xbf16> to vector<1x18x16x4xbf16>
    %25 = vector.extract_strided_slice %22 {offsets = [0, 0, 2, 0], sizes = [1, 18, 16, 4], strides = [1, 1, 1, 1]} : vector<1x18x24x4xbf16> to vector<1x18x16x4xbf16>
    %26 = tpu.concatenate %23, %24, %25 in 3 : vector<1x18x16x4xbf16>, vector<1x18x16x4xbf16>, vector<1x18x16x4xbf16> -> vector<1x18x16x12xbf16>
    %27 = vector.extract_strided_slice %26 {offsets = [0, 0, 0, 0], sizes = [1, 16, 16, 12], strides = [1, 1, 1, 1]} : vector<1x18x16x12xbf16> to vector<1x16x16x12xbf16>
    %28 = vector.extract_strided_slice %26 {offsets = [0, 1, 0, 0], sizes = [1, 16, 16, 12], strides = [1, 1, 1, 1]} : vector<1x18x16x12xbf16> to vector<1x16x16x12xbf16>
    %29 = vector.extract_strided_slice %26 {offsets = [0, 2, 0, 0], sizes = [1, 16, 16, 12], strides = [1, 1, 1, 1]} : vector<1x18x16x12xbf16> to vector<1x16x16x12xbf16>
    %30 = tpu.concatenate %27, %28, %29 in 3 : vector<1x16x16x12xbf16>, vector<1x16x16x12xbf16>, vector<1x16x16x12xbf16> -> vector<1x16x16x36xbf16>
    %31 = vector.shape_cast %30 : vector<1x16x16x36xbf16> to vector<256x36xbf16>
    %c0_27 = arith.constant 0 : index
    %c0_28 = arith.constant 0 : index
    %32 = vector.load %arg5[%c0_27, %c0_28] : memref<36x4xbf16, #tpu.memory_space<vmem>>, vector<36x4xbf16>
    %cst_29 = arith.constant dense<0.000000e+00> : vector<256x4xf32>
    %33 = tpu.matmul %31, %32, %cst_29 {dimension_numbers = #tpu.dot_dimension_numbers<[1], [0], [0], [1], [0, 0, 1, 1], [], []>} : vector<256x36xbf16>, vector<36x4xbf16>, vector<256x4xf32> -> vector<256x4xf32>
    %c0_30 = arith.constant 0 : index
    %c0_31 = arith.constant 0 : index
    %34 = vector.load %arg6[%c0_30, %c0_31] : memref<1x4xf32, #tpu.memory_space<vmem>>, vector<1x4xf32>
    %35 = vector.broadcast %34 : vector<1x4xf32> to vector<256x4xf32>
    %36 = arith.mulf %33, %35 : vector<256x4xf32>
    %c0_32 = arith.constant 0 : index
    %c0_33 = arith.constant 0 : index
    %37 = vector.load %arg7[%c0_32, %c0_33] : memref<1x4xf32, #tpu.memory_space<vmem>>, vector<1x4xf32>
    %38 = vector.broadcast %37 : vector<1x4xf32> to vector<256x4xf32>
    %39 = arith.addf %36, %38 : vector<256x4xf32>
    %cst_34 = arith.constant 0.000000e+00 : f32
    %40 = vector.broadcast %cst_34 : f32 to vector<256x4xf32>
    %41 = arith.maximumf %39, %40 : vector<256x4xf32>
    %42 = arith.truncf %41 : vector<256x4xf32> to vector<256x4xbf16>
    %c0_35 = arith.constant 0 : index
    %c0_36 = arith.constant 0 : index
    %43 = vector.load %arg8[%c0_35, %c0_36] : memref<4x16xbf16, #tpu.memory_space<vmem>>, vector<4x16xbf16>
    %cst_37 = arith.constant dense<0.000000e+00> : vector<256x16xf32>
    %44 = tpu.matmul %42, %43, %cst_37 {dimension_numbers = #tpu.dot_dimension_numbers<[1], [0], [0], [1], [0, 0, 1, 1], [], []>} : vector<256x4xbf16>, vector<4x16xbf16>, vector<256x16xf32> -> vector<256x16xf32>
    %c0_38 = arith.constant 0 : index
    %c0_39 = arith.constant 0 : index
    %45 = vector.load %arg9[%c0_38, %c0_39] : memref<1x16xf32, #tpu.memory_space<vmem>>, vector<1x16xf32>
    %46 = vector.broadcast %45 : vector<1x16xf32> to vector<256x16xf32>
    %47 = arith.mulf %44, %46 : vector<256x16xf32>
    %c0_40 = arith.constant 0 : index
    %c0_41 = arith.constant 0 : index
    %48 = vector.load %arg10[%c0_40, %c0_41] : memref<1x16xf32, #tpu.memory_space<vmem>>, vector<1x16xf32>
    %49 = vector.broadcast %48 : vector<1x16xf32> to vector<256x16xf32>
    %50 = arith.addf %47, %49 : vector<256x16xf32>
    %51 = arith.addf %50, %1 : vector<256x16xf32>
    %cst_42 = arith.constant 0.000000e+00 : f32
    %52 = vector.broadcast %cst_42 : f32 to vector<256x16xf32>
    %53 = arith.maximumf %51, %52 : vector<256x16xf32>
    %54 = vector.shape_cast %53 : vector<256x16xf32> to vector<1x16x16x16xf32>
    %c0_43 = arith.constant 0 : index
    %c0_44 = arith.constant 0 : index
    %c0_45 = arith.constant 0 : index
    %c0_46 = arith.constant 0 : index
    %55 = vector.load %arg11[%c0_43, %c0_44, %c0_45, %c0_46] : memref<1x16x16x16xf32, #tpu.memory_space<vmem>>, vector<1x16x16x16xf32>
    tpu.vector_store %arg11[%c0_43, %c0_44, %c0_45, %c0_46], %54 {strides = array<i32>} : memref<1x16x16x16xf32, #tpu.memory_space<vmem>>, vector<1x16x16x16xf32>,
    return
  }
  func.func @transform_0(%arg0: i32) -> (i32, i32, i32, i32) {
    %c0_i32 = arith.constant 0 : i32
    %c0_i32_0 = arith.constant 0 : i32
    %c0_i32_1 = arith.constant 0 : i32
    %c0_i32_2 = arith.constant 0 : i32
    return %arg0, %c0_i32, %c0_i32_0, %c0_i32_1 : i32, i32, i32, i32
  }
  func.func @transform_1(%arg0: i32) -> (i32, i32) {
    %c0_i32 = arith.constant 0 : i32
    %c0_i32_0 = arith.constant 0 : i32
    %c0_i32_1 = arith.constant 0 : i32
    return %c0_i32, %c0_i32_0 : i32, i32
  }
  func.func @transform_2(%arg0: i32) -> (i32, i32) {
    %c0_i32 = arith.constant 0 : i32
    %c0_i32_0 = arith.constant 0 : i32
    %c0_i32_1 = arith.constant 0 : i32
    return %c0_i32, %c0_i32_0 : i32, i32
  }
  func.func @transform_3(%arg0: i32) -> (i32, i32) {
    %c0_i32 = arith.constant 0 : i32
    %c0_i32_0 = arith.constant 0 : i32
    %c0_i32_1 = arith.constant 0 : i32
    return %c0_i32, %c0_i32_0 : i32, i32
  }
  func.func @transform_4(%arg0: i32) -> (i32, i32) {
    %c0_i32 = arith.constant 0 : i32
    %c0_i32_0 = arith.constant 0 : i32
    %c0_i32_1 = arith.constant 0 : i32
    return %c0_i32, %c0_i32_0 : i32, i32
  }
  func.func @transform_5(%arg0: i32) -> (i32, i32) {
    %c0_i32 = arith.constant 0 : i32
    %c0_i32_0 = arith.constant 0 : i32
    %c0_i32_1 = arith.constant 0 : i32
    return %c0_i32, %c0_i32_0 : i32, i32
  }
  func.func @transform_6(%arg0: i32) -> (i32, i32) {
    %c0_i32 = arith.constant 0 : i32
    %c0_i32_0 = arith.constant 0 : i32
    %c0_i32_1 = arith.constant 0 : i32
    return %c0_i32, %c0_i32_0 : i32, i32
  }
  func.func @transform_7(%arg0: i32) -> (i32, i32) {
    %c0_i32 = arith.constant 0 : i32
    %c0_i32_0 = arith.constant 0 : i32
    %c0_i32_1 = arith.constant 0 : i32
    return %c0_i32, %c0_i32_0 : i32, i32
  }
  func.func @transform_8(%arg0: i32) -> (i32, i32) {
    %c0_i32 = arith.constant 0 : i32
    %c0_i32_0 = arith.constant 0 : i32
    %c0_i32_1 = arith.constant 0 : i32
    return %c0_i32, %c0_i32_0 : i32, i32
  }
  func.func @transform_9(%arg0: i32) -> (i32, i32) {
    %c0_i32 = arith.constant 0 : i32
    %c0_i32_0 = arith.constant 0 : i32
    %c0_i32_1 = arith.constant 0 : i32
    return %c0_i32, %c0_i32_0 : i32, i32
  }
  func.func @transform_10(%arg0: i32) -> (i32, i32, i32, i32) {
    %c0_i32 = arith.constant 0 : i32
    %c0_i32_0 = arith.constant 0 : i32
    %c0_i32_1 = arith.constant 0 : i32
    %c0_i32_2 = arith.constant 0 : i32
    return %arg0, %c0_i32, %c0_i32_0, %c0_i32_1 : i32, i32, i32, i32
  }
}

</mosaic_0001>

<bundles_post_ra>
// kernel: tpu_custom_call.1
= control target key start
LH: loop header
LB: loop body
LE: loop exit
PB: predicated region body
PF: predicated region fallthrough
CT: control target
= control target key end

     0   :  { %15 = vsyncpa [#allocation4], 0  ;;  %s4177_s0 = inlined_call_operand.hbm [shape: f32[2,16,16,16], index: 0, kind: input, shape index: {}]   ;;  %s4178_s1 = inlined_call_operand.vmem [shape: bf16[16,4], index: 1, kind: input, shape index: {}]   ;;  %s4179_s2 = inlined_call_operand.vmem [shape: f32[1,4], index: 2, kind: input, shape index: {}]   ;;  %s4180_s3 = inlined_call_operand.vmem [shape: f32[1,4], index: 3, kind: input, shape index: {}]   ;;  %s4181_s4 = inlined_call_operand.vmem [shape: bf16[36,4], index: 4, kind: input, shape index: {}]   ;;  %s4182_s5 = inlined_call_operand.vmem [shape: f32[1,4], index: 5, kind: input, shape index: {}]   ;;  %s4183_s6 = inlined_call_operand.vmem [shape: f32[1,4], index: 6, kind: input, shape index: {}]   ;;  %s4184_s7 = inlined_call_operand.vmem [shape: bf16[4,16], index: 7, kind: input, shape index: {}]   ;;  %s4185_s8 = inlined_call_operand.vmem [shape: f32[1,16], index: 8, kind: input, shape index: {}]   ;;  %s4186_s9 = inlined_call_operand.vmem [shape: f32[1,16], index: 9, kind: input, shape index: {}]   ;;  %s4187_s10 = inlined_call_operand.hbm [shape: f32[2,16,16,16], index: 10, kind: output, shape index: {}]  }
   0x1   :  { %17 = vsyncpa [#allocation4 + $0x1], 0 }
   0x2   :  { %18 = vsyncpa [#allocation5], 0 }
   0x3   :  { %20 = vsyncpa [#allocation5 + $0x1], 0  ;;  %s3093_s13 = smov 0   ;;  %s3095_s14 = smov 0  }
   0x4   :  { %s3097_s15 = smov 0   ;;  %s3099_s16 = smov 0  }
   0x5 LB: > { %4192 = sst [smem:[#allocation9_spill]] %s3024_s15  ;;  %s3114_s17 = sadd.s32 4294967295, %s3028_s16   ;;  %s3028_s16 = sphi %s3099_s16, %s4205_s16   ;;  %s3024_s15 = sphi %s3097_s15, %s4207_s15   ;;  %s3020_s14 = sphi %s3095_s14, %s4209_s14   ;;  %s3016_s13 = sphi %s3093_s13, %s4208_s13  }
   0x6   : > { %s2664_s18 = sadd.s32 4294967294, %s3028_s16   ;;  %s3118_s19 = sadd.s32 1, %s3028_s16  }
   0x7   : > { %4193 = sst [smem:[#allocation10_spill]] %s3118_s19  ;;  %s33_s20 = sadd.s32 1, %s3024_s15 }
   0x8   : > { %s30_s21 = ssub.s32 %s3028_s16, %s3118_s19  ;;  %p40_p0 = scmp.ne.s32.totalorder %s3024_s15, %s3020_s14 }
   0x9   : > { %p31_p1 = scmp.eq.s32.totalorder %s30_s21, 0  ;;  %p41_p2 = scmp.eq.s32.totalorder %s3028_s16, 0 }
   0xa   : > { %p46_p3 = scmp.ne.s32.totalorder %s3020_s14, %s3016_s13  ;;  %p47_p4 = scmp.eq.s32.totalorder %s3114_s17, 0 }
   0xb   : > { %s3130_s22 = scalar_select %p31_p1, %s3024_s15, %s33_s20  }
   0xc   : > { %p3132_p5 = por %p41_p2, %p40_p0  ;;  %p3136_p6 = por %p47_p4, %p46_p3 }
   0xd   : > { %4194 = sst [smem:[#allocation11_spill]] %s3130_s22  ;;  %p259_p7 = scmp.eq.s32.totalorder %s3114_s17, 1 }
   0xe   : > { %p265_p8 = scmp.eq.s32.totalorder %s2664_s18, 1  ;;  %p2850_p10 = scmp.lt.s32.totalorder %s3028_s16, 2 }
   0xf   : > { %p3143_p11 = por %p259_p7, %p40_p0  ;;  %s312_s27 = sand.u32 1, %s3024_s15  }
  0x10   : > { %p3147_p12 = por %p265_p8, %p46_p3  ;;  %s2810_s28 = sshll.u32 %s3028_s16, 8 }
  0x11   : > { %s2667_s29 = sshll.u32 %s312_s27, 8  ;;  %s321_s12 = scalar_lea.hbm %s4177_s0, %s2810_s28 }
  0x12   : > { %s4198_s26 = scalar_select %p3147_p12, 1, 0 }
  0x13   : > { %s322_s20 = sshll.u32 %s321_s12, 4  ;;  %s316_s18 = scalar_lea.vmem [#allocation3], %s2667_s29  ;;  %s323_s20 = int_to_ptr.hbm [resolvable:$true] %s322_s20 }
  0x14   : > { %4199 = sst [smem:[#allocation12_spill]] %s4198_s26  ;;  %s324_s21 = sshll.u32 %s316_s18, 4  ;;  %s325_s21 = int_to_ptr.vmem [resolvable:$true] %s324_s21 }
  0x15   : > { %p3158_p13 = pnand %p2850_p10, %p3132_p5  ;;  %p2670_p0 = scmp.ge.s32.totalorder %s3028_s16, 1 }
  0x16   : > { %p332_p1 = scmp.lt.s32.totalorder %s3028_s16, 3  ;;  %s313_s15 = scalar_lea.sflag [#allocation4], %s312_s27 }
  0x17   : > { %s2932_s19 = sshra.s32 %s323_s20, 4  ;;  %p2936_p3 = pneg %p3158_p13  ;;  %s2933_s19 = int_to_ptr.hbm [resolvable:$true] %s2932_s19 }
  0x18   : > { %s2934_s26 = scalar_lea.hbm %s2933_s19, 256  ;;  %s2939_s23 = scalar_lea.hbm %s4177_s0, 512 }
  0x19   : > { %p2935_p2 = scmp.ne.s32.totalorder %s2933_s19, %s2934_s26  ;;  %p2940_p5 = scmp.lt.s32.totalorder %s2933_s19, %s4177_s0 }
  0x1a   : > { %p2941_p8 = scmp.lt.s32.totalorder %s2939_s23, %s2934_s26 }
  0x1b   : > { %p2937_p4 = pnand %p2936_p3, %p2935_p2 }
  0x1c   : > { %p2942_p10 = por %p2941_p8, %p2940_p5 }
  0x1d   : > { %p2938_p7 = pneg %p2937_p4 }
  0x1f   : > { %p2943_p9 = pnand %p2942_p10, %p2938_p7 }
  0x21   : > { %2946 = shalt.err (!%p2943_p9)
}
  0x22   : > { %s3030_s27 = smov 128   ;;  %s3031_s12 = smov 8  }
  0x23   : > { %2845 = dma.hbm_to_vmem [thread:$0]  (!%p3158_p13), %s323_s20, 4096, %s325_s21, %s313_s15, %s3030_s27, %s3030_s27, %s3031_s12  }
  0x24   : > { %p333_p2 = pnand %p2670_p0, %p332_p1 }
  0x25   : > { %s3179_s18 = sand.u32 (!%p333_p2), 1, %s3020_s14  }
  0x26   : > { %336 = sbr.rel (%p333_p2) target bundleno = 1160 (0x488), region = 60  ;;  %s2671_s19 = sshll.u32 (!%p333_p2), %s3179_s18, 8 }
  0x27   : > { %s339_s26 = scalar_lea.sflag (!%p333_p2), [#allocation4], %s3179_s18  ;;  %s3185_s28 = scalar_lea.vmem (!%p333_p2), [#allocation3], %s2671_s19 }
  0x2b   : > { %3007 = dma.done.wait (%p3136_p6), %s339_s26, 4096  }
  0x2c   : > { %3009 = vsyncadd (%p3136_p6), %s339_s26, 4294963200  ;;  %v2811_v0 = vld [vmem:[%s4178_s1] sm:$0xff]  ;;  %v381_v1 = vld [vmem:[%s3185_s28] sm:$0xff]  ;;  %vm437_vm0 = vcmask 130048   ;;  %vm943_vm1 = vcmask 1040384   ;;  %vm711_vm4 = vcmask 27648  }
  0x2d   : > { %v382_v2 = vld [vmem:[%s3185_s28 + $0x8] sm:$0xff]  ;;  %493 = vmatpush.bf16.msra.mxu0 %v2811_v0  ;;  %2833 = vmatpush.bf16.msra.mxu3 %v2811_v0  ;;  %v383_v4 = vld [vmem:[%s3185_s28 + $0x10] sm:$0xff]  ;;  %v384_v5 = vld [vmem:[%s3185_s28 + $0x18] sm:$0xff]  ;;  %vm944_vm2 = vsmask.f32 256  ;;  %vm1688_vm5 = vcmask 1046528  }
  0x2e   : > { %v413_v3 = vpack.c.bf16 %v382_v2, %v381_v1  ;;  %v414_v6 = vpack.c.bf16 %v384_v5, %v383_v4  ;;  %v385_v7 = vld [vmem:[%s3185_s28 + $0x20] sm:$0xff]  ;;  %v386_v8 = vld [vmem:[%s3185_s28 + $0x28] sm:$0xff]  ;;  %v387_v10 = vld [vmem:[%s3185_s28 + $0x30] sm:$0xff]  ;;  %vm1435_vm6 = vsmask.f32 7424  ;;  %s3032_s23 = smov 8  }
  0x2f   : > { %v415_v9 = vpack.c.bf16 %v386_v8, %v385_v7  ;;  %v388_v11 = vld [vmem:[%s3185_s28 + $0x38] sm:$0xff]  ;;  %v389_v13 = vld [vmem:[%s3185_s28 + $0x40] sm:$0xff]  ;;  %v390_v14 = vld [vmem:[%s3185_s28 + $0x48] sm:$0xff]  ;;  %s3033_s30 = smov 4   ;;  %vm1779_vm7 = vcmask 31744   ;;  %vm1816_vm8 = vcmask 64512  }
  0x30   : > { %2677 = vmatmul.msk.bf16.vlgmr.msra.gmra.mxu0 %vm437_vm0, %v413_v3  ;;  %v416_v12 = vpack.c.bf16 %v388_v11, %v387_v10  ;;  %v417_v15 = vpack.c.bf16 %v390_v14, %v389_v13  ;;  %v391_v16 = vld [vmem:[%s3185_s28 + $0x50] sm:$0xff]  ;;  %v392_v17 = vld [vmem:[%s3185_s28 + $0x58] sm:$0xff]  ;;  %v393_v19 = vld [vmem:[%s3185_s28 + $0x60] sm:$0xff]  ;;  %s3035_s11 = smov 12   ;;  %s3036_s27 = smov 24   ;;  %vm2053_vm9 = vcmask 1041408  }
  0x31   : > { %v418_v18 = vpack.c.bf16 %v392_v17, %v391_v16  ;;  %v394_v20 = vld [vmem:[%s3185_s28 + $0x68] sm:$0xff]  ;;  %v395_v23 = vld [vmem:[%s3185_s28 + $0x70] sm:$0xff]  ;;  %v396_v24 = vld [vmem:[%s3185_s28 + $0x78] sm:$0xff]  ;;  %vm1934_vm10 = vcmask 97280   ;;  %vm1967_vm11 = vcmask 195584   ;;  %vm2020_vm12 = vcmask 293888  }
  0x32   : > { %v419_v21 = vpack.c.bf16 %v394_v20, %v393_v19  ;;  %v3218_v22 = vld [vmem:[%s4179_s2] ss:$0 sm:$0xff]  ;;  %v420_v25 = vpack.c.bf16 %v396_v24, %v395_v23  ;;  %vm3235_vm3 = vmand %vm943_vm1, %vm944_vm2  ;;  %v397_v0 = vld [vmem:[%s3185_s28 + $0x80] sm:$0xff]  ;;  %s3899_s15 = scalar_lea.vmem [#allocation6], %s2671_s19  ;;  %s2832_s19 = sshll.u32 %s3114_s17, 8 }
  0x33   : > { %v3227_v28 = vld [vmem:[%s4180_s3] ss:$0 sm:$0xff]  ;;  %s2587_s24 = scalar_lea.hbm %s4187_s10, %s2832_s19  ;;  %s2588_s20 = sshll.u32 %s3899_s15, 4  ;;  %s2589_s20 = int_to_ptr.vmem [resolvable:$true] %s2588_s20 }
  0x34   : > { %v398_v1 = vld [vmem:[%s3185_s28 + $0x88] sm:$0xff]  ;;  %s2590_s21 = sshll.u32 %s2587_s24, 4  ;;  %s2576_s17 = scalar_lea.sflag [#allocation5], %s3179_s18  ;;  %s2591_s21 = int_to_ptr.hbm [resolvable:$true] %s2590_s21 }
  0x35   : > { %v421_v3 = vpack.c.bf16 %v398_v1, %v397_v0  ;;  %s2976_s29 = sshra.s32 %s2591_s21, 4  ;;  %s2982_s26 = scalar_lea.hbm %s4187_s10, 512  ;;  %s2977_s29 = int_to_ptr.hbm [resolvable:$true] %s2976_s29 }
  0x36   : > { %p2983_p0 = scmp.lt.s32.totalorder %s2977_s29, %s4187_s10 }
  0x40   : > { %2678 = vmatmul.msk.bf16.gmra.mxu0 %vm437_vm0, %v414_v6 }
  0x50   : > { %2679 = vmatmul.msk.bf16.gmra.mxu0 %vm437_vm0, %v415_v9 }
  0x60   : > { %2680 = vmatmul.msk.bf16.gmra.mxu0 %vm437_vm0, %v416_v12 }
  0x70   : > { %2681 = vmatmul.msk.bf16.gmra.mxu0 %vm437_vm0, %v417_v15 }
  0x80   : > { %2682 = vmatmul.msk.bf16.gmra.mxu0 %vm437_vm0, %v418_v18 }
  0x90   : > { %2683 = vmatmul.msk.bf16.gmra.mxu0 %vm437_vm0, %v419_v21 }
  0xa0   : > { %2684 = vmatmul.msk.bf16.gmra.mxu0 %vm437_vm0, %v420_v25 }
  0xad   : > { %v495_v26 = vpop.f32.mrf.mxu0 }
  0xae   : > { %v579_v27 = vmul.f32 %v3218_v22, %v495_v26 }
  0xb0   : > { %v615_v29 = vadd.f32 %v3227_v28, %v579_v27  ;;  %2685 = vmatmul.msk.bf16.gmra.mxu0 %vm437_vm0, %v421_v3 }
  0xb2   : > { %v647_v31 = vmax.f32 %v615_v29, 0.0 }
  0xb4   : > { %v679_v34 = vpack.c.bf16 %v647_v31, %v647_v31 }
  0xb5   : > { %v497_v30 = vpop.f32.mrf.mxu0 }
  0xb6   : > { %v580_v32 = vmul.f32 %v3218_v22, %v497_v30  ;;  %v751_v38 = vunpack.c.l.b16 %v679_v34 }
  0xb8   : > { %v616_v33 = vadd.f32 %v3227_v28, %v580_v32 }
  0xba   : > { %v648_v35 = vmax.f32 %v616_v33, 0.0 }
  0xbc   : > { %v680_v36 = vpack.c.bf16 %v648_v35, %v648_v35 }
  0xbd   : > { %v500_v37 = vpop.f32.mrf.mxu0 }
  0xbe   : > { %v752_v39 = vunpack.c.l.b16 %v680_v36  ;;  %v581_v40 = vmul.f32 %v3218_v22, %v500_v37 }
  0xc0   : > { %v783_v41 = vpack.c.b16 %v752_v39, %v751_v38  ;;  %v617_v43 = vadd.f32 %v3227_v28, %v581_v40 }
  0xc2   : > { %v800_v42 = vshrl.u32 %v783_v41, 16  ;;  %v803_v46 = vshll.u32 %v783_v41, 16  ;;  %v649_v50 = vmax.f32 %v617_v43, 0.0 }
  0xc4   : > { %v802_v45 = vrot.slane %v800_v42, 7  ;;  %v681_v59 = vpack.c.bf16 %v649_v50, %v649_v50 }
  0xc5   : > { %v502_v47 = vpop.f32.mrf.mxu0 }
  0xc6   : > { %v805_v48 = vor.u32 %v803_v46, %v802_v45  ;;  %v962_v49 = vsel %vm3235_vm3, %v802_v45, 0  ;;  %v582_v51 = vmul.f32 %v3218_v22, %v502_v47  ;;  %v753_v4 = vunpack.c.l.b16 %v681_v59 }
  0xc7   : > { %v981_v52 = vsel %vm943_vm1, %v962_v49, 0 }
  0xc8   : > { %v946_v53 = vsel %vm3235_vm3, 0, %v805_v48  ;;  %v1046_v54 = vunpack.c.l.b16 %v981_v52  ;;  %v618_v55 = vadd.f32 %v3227_v28, %v582_v51 }
  0xc9   : > { %v1044_v56 = vunpack.c.l.b16 %v946_v53  ;;  %v1045_v57 = vunpack.c.h.b16 %v946_v53 }
  0xca   : > { %v1094_v58 = vpack.c.b16 %v1046_v54, %v1046_v54  ;;  %v650_v60 = vmax.f32 %v618_v55, 0.0 }
  0xcb   : > { %v1092_v61 = vpack.c.b16 %v1044_v56, %v1044_v56  ;;  %v1093_v62 = vpack.c.b16 %v1045_v57, %v1045_v57 }
  0xcc   : > { %1191 = vst.msk [vmem:[#allocation2 + $0x14] sm:$0xf] %vm711_vm4, %v1094_v58  ;;  %v682_v63 = vpack.c.bf16 %v650_v60, %v650_v60 }
  0xcd   : > { %1189 = vst.msk [vmem:[#allocation2 + $0xc] sm:$0xf] %vm711_vm4, %v1092_v61  ;;  %v505_v2 = vpop.f32.mrf.mxu0 }
  0xce   : > { %1190 = vst.msk [vmem:[#allocation2 + $0x10] sm:$0xf] %vm711_vm4, %v1093_v62  ;;  %v754_v5 = vunpack.c.l.b16 %v682_v63  ;;  %v583_v6 = vmul.f32 %v3218_v22, %v505_v2 }
  0xd0   : > { %v784_v7 = vpack.c.b16 %v754_v5, %v753_v4  ;;  %v619_v8 = vadd.f32 %v3227_v28, %v583_v6 }
  0xd2   : > { %v807_v9 = vshrl.u32 %v784_v7, 16  ;;  %v651_v10 = vmax.f32 %v619_v8, 0.0  ;;  %v810_v13 = vshll.u32 %v784_v7, 16 }
  0xd3   : > { %v1242_v11 = vld [vmem:[#allocation2 + $0x14] sm:$0xf] }
  0xd4   : > { %v809_v12 = vrot.slane %v807_v9, 7  ;;  %v1400_v14 = vunpack.c.l.b16 %v1242_v11  ;;  %v683_v21 = vpack.c.bf16 %v651_v10, %v651_v10 }
  0xd5   : > { %v507_v15 = vpop.f32.mrf.mxu0  ;;  %v3254_v16 = vld [vmem:[#allocation2 + $0xc] sm:$0xff] }
  0xd6   : > { %v812_v17 = vor.u32 %v810_v13, %v809_v12  ;;  %v963_v18 = vsel %vm3235_vm3, %v809_v12, 0  ;;  %v584_v19 = vmul.f32 %v3218_v22, %v507_v15  ;;  %v1418_v23 = vpack.c.b16 %v1400_v14, %v1400_v14 }
  0xd7   : > { %v983_v20 = vsel %vm943_vm1, %v963_v18, 0  ;;  %v1692_v24 = vrot.slane %v3254_v16, 1  ;;  %v1451_v29 = vshll.u32 %v3254_v16, 16  ;;  %v1449_v36 = vshrl.u32 %v3254_v16, 16 }
  0xd8   : > { %v947_v25 = vsel %vm3235_vm3, 0, %v812_v17  ;;  %v1049_v26 = vunpack.c.l.b16 %v983_v20  ;;  %v620_v27 = vadd.f32 %v3227_v28, %v584_v19  ;;  %v1693_v32 = vrot.slane %v1418_v23, 1 }
  0xd9   : > { %v1047_v30 = vunpack.c.l.b16 %v947_v25  ;;  %v1048_v31 = vunpack.c.h.b16 %v947_v25  ;;  %v1456_v33 = vshll.u32 %v1418_v23, 16  ;;  %v1453_v37 = vrot.slane %v1451_v29, 1 }
  0xda   : > { %v1097_v34 = vpack.c.b16 %v1049_v26, %v1049_v26  ;;  %v652_v35 = vmax.f32 %v620_v27, 0.0  ;;  %v1694_v40 = vsel %vm1688_vm5, %v1692_v24, %v1693_v32  ;;  %v755_v46 = vunpack.c.l.b16 %v683_v21 }
  0xdb   : > { %v1095_v38 = vpack.c.b16 %v1047_v30, %v1047_v30  ;;  %v1096_v39 = vpack.c.b16 %v1048_v31, %v1048_v31  ;;  %v1458_v41 = vrot.slane %v1456_v33, 1  ;;  %1745 = vrot.lane.b32.xlu1 %v1694_v40, %s3032_s23  ;;  %v1454_v43 = vor.u32 %v1453_v37, %v1449_v36  ;;  %v399_v30 = vld [vmem:[%s3185_s28 + $0x90] sm:$0xff]  ;;  %v400_v31 = vld [vmem:[%s3185_s28 + $0x98] sm:$0xff] }
  0xdc   : > { %1194 = vst.msk [vmem:[#allocation2 + $0x20] sm:$0xf] %vm711_vm4, %v1097_v34  ;;  %v684_v42 = vpack.c.bf16 %v652_v35, %v652_v35  ;;  %v3034_v20 = vmov 0   ;;  %v422_v32 = vpack.c.bf16 %v400_v31, %v399_v30 }
  0xdd   : > { %1192 = vst.msk [vmem:[#allocation2 + $0x18] sm:$0xf] %vm711_vm4, %v1095_v38  ;;  %v510_v45 = vpop.f32.mrf.mxu0  ;;  %v1459_v49 = vsel %vm1435_vm6, %v1454_v43, %v1458_v41 }
  0xde   : > { %1193 = vst.msk [vmem:[#allocation2 + $0x1c] sm:$0xf] %vm711_vm4, %v1096_v39  ;;  %v756_v47 = vunpack.c.l.b16 %v684_v42  ;;  %v585_v48 = vmul.f32 %v3218_v22, %v510_v45  ;;  %1654 = vrot.lane.b32.xlu0 %v1459_v49, %s3033_s30  ;;  %2686 = vmatmul.msk.bf16.gmra.mxu0 %vm437_vm0, %v422_v32 }
  0xdf   : > { %712 = vst.msk [vmem:[#allocation2] sm:$0xf] %vm711_vm4, %v3034_v20 }
  0xe0   : > { %v785_v50 = vpack.c.b16 %v756_v47, %v755_v46  ;;  %v621_v51 = vadd.f32 %v3227_v28, %v585_v48  ;;  %713 = vst.msk [vmem:[#allocation2 + $0x4] sm:$0xf] %vm711_vm4, %v3034_v20 }
  0xe1   : > { %714 = vst.msk [vmem:[#allocation2 + $0x8] sm:$0xf] %vm711_vm4, %v3034_v20 }
  0xe2   : > { %v814_v52 = vshrl.u32 %v785_v50, 16  ;;  %v653_v53 = vmax.f32 %v621_v51, 0.0  ;;  %v817_v56 = vshll.u32 %v785_v50, 16  ;;  %716 = vst.msk [vmem:[#allocation2 + $0xcc] sm:$0xf] %vm711_vm4, %v3034_v20 }
  0xe3   : > { %v1245_v54 = vld [vmem:[#allocation2 + $0x20] sm:$0xf]  ;;  %717 = vst.msk [vmem:[#allocation2 + $0xd0] sm:$0xf] %vm711_vm4, %v3034_v20 }
  0xe4   : > { %v816_v55 = vrot.slane %v814_v52, 7  ;;  %v1401_v57 = vunpack.c.l.b16 %v1245_v54  ;;  %v685_v62 = vpack.c.bf16 %v653_v53, %v653_v53  ;;  %718 = vst.msk [vmem:[#allocation2 + $0xd4] sm:$0xf] %vm711_vm4, %v3034_v20  ;;  %v407_v20 = vld [vmem:[%s3185_s28 + $0xd0] sm:$0xff] }
  0xe5   : > { %v512_v58 = vpop.f32.mrf.mxu0  ;;  %v3275_v59 = vld [vmem:[#allocation2 + $0x18] sm:$0xff] }
  0xe6   : > { %v819_v60 = vor.u32 %v817_v56, %v816_v55  ;;  %v964_v61 = vsel %vm3235_vm3, %v816_v55, 0  ;;  %v586_v63 = vmul.f32 %v3218_v22, %v512_v58  ;;  %v1419_v1 = vpack.c.b16 %v1401_v57, %v1401_v57 }
  0xe7   : > { %v985_v0 = vsel %vm943_vm1, %v964_v61, 0  ;;  %v1695_v2 = vrot.slane %v3275_v59, 1  ;;  %v1461_v3 = vshrl.u32 %v3275_v59, 16  ;;  %v1463_v7 = vshll.u32 %v3275_v59, 16 }
  0xe8   : > { %v948_v4 = vsel %vm3235_vm3, 0, %v819_v60  ;;  %v1052_v5 = vunpack.c.l.b16 %v985_v0  ;;  %v622_v6 = vadd.f32 %v3227_v28, %v586_v63  ;;  %v1696_v10 = vrot.slane %v1419_v1, 1 }
  0xe9   : > { %v1050_v8 = vunpack.c.l.b16 %v948_v4  ;;  %v1051_v9 = vunpack.c.h.b16 %v948_v4  ;;  %v1468_v11 = vshll.u32 %v1419_v1, 16  ;;  %v1465_v14 = vrot.slane %v1463_v7, 1  ;;  %v402_v7 = vld [vmem:[%s3185_s28 + $0xa8] sm:$0xff] }
  0xea   : > { %v1100_v12 = vpack.c.b16 %v1052_v5, %v1052_v5  ;;  %v654_v13 = vmax.f32 %v622_v6, 0.0  ;;  %v1697_v18 = vsel %vm1688_vm5, %v1695_v2, %v1696_v10  ;;  %v757_v25 = vunpack.c.l.b16 %v685_v62  ;;  %v401_v6 = vld [vmem:[%s3185_s28 + $0xa0] sm:$0xff] }
  0xeb   : > { %v1098_v15 = vpack.c.b16 %v1050_v8, %v1050_v8  ;;  %v1099_v17 = vpack.c.b16 %v1051_v9, %v1051_v9  ;;  %v1470_v19 = vrot.slane %v1468_v11, 1  ;;  %1747 = vrot.lane.b32.xlu1 %v1697_v18, %s3032_s23  ;;  %v1466_v23 = vor.u32 %v1465_v14, %v1461_v3 }
  0xec   : > { %1197 = vst.msk [vmem:[#allocation2 + $0x2c] sm:$0xf] %vm711_vm4, %v1100_v12  ;;  %v686_v21 = vpack.c.bf16 %v654_v13, %v654_v13  ;;  %v423_v9 = vpack.c.bf16 %v402_v7, %v401_v6 }
  0xed   : > { %1195 = vst.msk [vmem:[#allocation2 + $0x24] sm:$0xf] %vm711_vm4, %v1098_v15  ;;  %v515_v24 = vpop.f32.mrf.mxu0  ;;  %v1471_v29 = vsel %vm1435_vm6, %v1466_v23, %v1470_v19  ;;  %v1239_v15 = vld [vmem:[#allocation2 + $0x8] sm:$0xf] }
  0xee   : > { %1196 = vst.msk [vmem:[#allocation2 + $0x28] sm:$0xf] %vm711_vm4, %v1099_v17  ;;  %v758_v26 = vunpack.c.l.b16 %v686_v21  ;;  %v587_v27 = vmul.f32 %v3218_v22, %v515_v24  ;;  %1656 = vrot.lane.b32.xlu0 %v1471_v29, %s3033_s30  ;;  %2687 = vmatmul.msk.bf16.gmra.mxu0 %vm437_vm0, %v423_v9  ;;  %v408_v21 = vld [vmem:[%s3185_s28 + $0xd8] sm:$0xff]  ;;  %v1399_v32 = vunpack.c.l.b16 %v1239_v15 }
  0xf0   : > { %v786_v33 = vpack.c.b16 %v758_v26, %v757_v25  ;;  %v623_v34 = vadd.f32 %v3227_v28, %v587_v27  ;;  %v426_v25 = vpack.c.bf16 %v408_v21, %v407_v20 }
  0xf2   : > { %v821_v35 = vshrl.u32 %v786_v33, 16  ;;  %v655_v36 = vmax.f32 %v623_v34, 0.0  ;;  %v824_v39 = vshll.u32 %v786_v33, 16  ;;  %2690 = vmatmul.msk.bf16.vlgmr.msra.gmra.mxu3 %vm437_vm0, %v426_v25 }
  0xf3   : > { %v1248_v37 = vld [vmem:[#allocation2 + $0x2c] sm:$0xf] }
  0xf4   : > { %v823_v38 = vrot.slane %v821_v35, 7  ;;  %v1402_v40 = vunpack.c.l.b16 %v1248_v37  ;;  %v687_v48 = vpack.c.bf16 %v655_v36, %v655_v36 }
  0xf5   : > { %v517_v41 = vpop.f32.mrf.mxu0  ;;  %v3305_v42 = vld [vmem:[#allocation2 + $0x24] sm:$0xff] }
  0xf6   : > { %v826_v43 = vor.u32 %v824_v39, %v823_v38  ;;  %v965_v45 = vsel %vm3235_vm3, %v823_v38, 0  ;;  %v588_v46 = vmul.f32 %v3218_v22, %v517_v41  ;;  %v1420_v49 = vpack.c.b16 %v1402_v40, %v1402_v40 }
  0xf7   : > { %v987_v47 = vsel %vm943_vm1, %v965_v45, 0  ;;  %v1475_v50 = vshll.u32 %v3305_v42, 16  ;;  %v1473_v54 = vshrl.u32 %v3305_v42, 16  ;;  %v759_v2 = vunpack.c.l.b16 %v687_v48 }
  0xf8   : > { %v949_v51 = vsel %vm3235_vm3, 0, %v826_v43  ;;  %v1055_v52 = vunpack.c.l.b16 %v987_v47  ;;  %v624_v53 = vadd.f32 %v3227_v28, %v588_v46  ;;  %v1480_v58 = vshll.u32 %v1420_v49, 16 }
  0xf9   : > { %v1053_v55 = vunpack.c.l.b16 %v949_v51  ;;  %v1054_v56 = vunpack.c.h.b16 %v949_v51  ;;  %v1477_v57 = vrot.slane %v1475_v50, 1  ;;  %v1699_v12 = vrot.slane %v1420_v49, 1 }
  0xfa   : > { %v1103_v60 = vpack.c.b16 %v1055_v52, %v1055_v52  ;;  %v656_v61 = vmax.f32 %v624_v53, 0.0  ;;  %v1482_v1 = vrot.slane %v1480_v58, 1  ;;  %v1698_v17 = vrot.slane %v3305_v42, 1  ;;  %v403_v52 = vld [vmem:[%s3185_s28 + $0xb0] sm:$0xff]  ;;  %v404_v53 = vld [vmem:[%s3185_s28 + $0xb8] sm:$0xff] }
  0xfb   : > { %v1101_v62 = vpack.c.b16 %v1053_v55, %v1053_v55  ;;  %v1102_v63 = vpack.c.b16 %v1054_v56, %v1054_v56  ;;  %v1478_v0 = vor.u32 %v1477_v57, %v1473_v54  ;;  %v3347_v57 = vld [vmem:[#allocation2] sm:$0xff]  ;;  %v3349_v58 = vpack.c.b16 %v1399_v32, %v1399_v32 }
  0xfc   : > { %1200 = vst.msk [vmem:[#allocation2 + $0x38] sm:$0xf] %vm711_vm4, %v1103_v60  ;;  %v688_v3 = vpack.c.bf16 %v656_v61, %v656_v61  ;;  %v1700_v26 = vsel %vm1688_vm5, %v1698_v17, %v1699_v12 }
  0xfd   : > { %1198 = vst.msk [vmem:[#allocation2 + $0x30] sm:$0xf] %vm711_vm4, %v1101_v62  ;;  %v1483_v4 = vsel %vm1435_vm6, %v1478_v0, %v1482_v1  ;;  %v520_v8 = vpop.f32.mrf.mxu0  ;;  %v1689_v1 = vrot.slane %v3347_v57, 1 }
  0xfe   : > { %1199 = vst.msk [vmem:[#allocation2 + $0x34] sm:$0xf] %vm711_vm4, %v1102_v63  ;;  %v760_v5 = vunpack.c.l.b16 %v688_v3  ;;  %1658 = vrot.lane.b32.xlu2 %v1483_v4, %s3033_s30  ;;  %v589_v10 = vmul.f32 %v3218_v22, %v520_v8  ;;  %v424_v63 = vpack.c.bf16 %v404_v53, %v403_v52 }
 0x100   : > { %v787_v11 = vpack.c.b16 %v760_v5, %v759_v2  ;;  %v625_v19 = vadd.f32 %v3227_v28, %v589_v10  ;;  %v1690_v2 = vrot.slane %v3349_v58, 1  ;;  %2688 = vmatmul.msk.bf16.gmra.mxu0 %vm437_vm0, %v424_v63 }
 0x102   : > { %v828_v13 = vshrl.u32 %v787_v11, 16  ;;  %v831_v14 = vshll.u32 %v787_v11, 16  ;;  %v657_v36 = vmax.f32 %v625_v19, 0.0  ;;  %v1691_v6 = vsel %vm1688_vm5, %v1689_v1, %v1690_v2  ;;  %v409_v1 = vld [vmem:[%s3185_s28 + $0xe0] sm:$0xff]  ;;  %v410_v2 = vld [vmem:[%s3185_s28 + $0xe8] sm:$0xff] }
 0x103   : > { %v1251_v18 = vld [vmem:[#allocation2 + $0x38] sm:$0xf] }
 0x104   : > { %v830_v23 = vrot.slane %v828_v13, 7  ;;  %v1403_v24 = vunpack.c.l.b16 %v1251_v18  ;;  %v689_v60 = vpack.c.bf16 %v657_v36, %v657_v36 }
 0x105   : > { %v3330_v27 = vld [vmem:[#allocation2 + $0x30] sm:$0xff]  ;;  %v522_v47 = vpop.f32.mrf.mxu0 }
 0x106   : > { %v833_v29 = vor.u32 %v831_v14, %v830_v23  ;;  %v966_v30 = vsel %vm3235_vm3, %v830_v23, 0  ;;  %1749 = vrot.lane.b32.xlu2 %v1700_v26, %s3032_s23  ;;  %v1421_v31 = vpack.c.b16 %v1403_v24, %v1403_v24  ;;  %v1701_v34 = vrot.slane %v3330_v27, 1 }
 0x107   : > { %v989_v33 = vsel %vm943_vm1, %v966_v30, 0  ;;  %v1487_v35 = vshll.u32 %v3330_v27, 16  ;;  %v1485_v45 = vshrl.u32 %v3330_v27, 16  ;;  %v590_v51 = vmul.f32 %v3218_v22, %v522_v47  ;;  %v405_v30 = vld [vmem:[%s3185_s28 + $0xc0] sm:$0xff] }
 0x108   : > { %v950_v37 = vsel %vm3235_vm3, 0, %v833_v29  ;;  %v1058_v38 = vunpack.c.l.b16 %v989_v33  ;;  %v1702_v39 = vrot.slane %v1421_v31, 1  ;;  %v1492_v40 = vshll.u32 %v1421_v31, 16  ;;  %v406_v31 = vld [vmem:[%s3185_s28 + $0xc8] sm:$0xff] }
 0x109   : > { %v1056_v41 = vunpack.c.l.b16 %v950_v37  ;;  %v1057_v43 = vunpack.c.h.b16 %v950_v37  ;;  %v1489_v46 = vrot.slane %v1487_v35, 1  ;;  %v626_v61 = vadd.f32 %v3227_v28, %v590_v51 }
 0x10a   : > { %v1106_v48 = vpack.c.b16 %v1058_v38, %v1058_v38  ;;  %v1703_v49 = vsel %vm1688_vm5, %v1701_v34, %v1702_v39  ;;  %v1494_v50 = vrot.slane %v1492_v40, 1  ;;  %v761_v3 = vunpack.c.l.b16 %v689_v60 }
 0x10b   : > { %v1104_v54 = vpack.c.b16 %v1056_v41, %v1056_v41  ;;  %v1105_v55 = vpack.c.b16 %v1057_v43, %v1057_v43  ;;  %1751 = vrot.lane.b32.xlu1 %v1703_v49, %s3032_s23  ;;  %v1490_v56 = vor.u32 %v1489_v46, %v1485_v45  ;;  %v658_v0 = vmax.f32 %v626_v61, 0.0 }
 0x10c   : > { %1203 = vst.msk [vmem:[#allocation2 + $0x44] sm:$0xf] %vm711_vm4, %v1106_v48  ;;  %v425_v34 = vpack.c.bf16 %v406_v31, %v405_v30 }
 0x10d   : > { %1201 = vst.msk [vmem:[#allocation2 + $0x3c] sm:$0xf] %vm711_vm4, %v1104_v54  ;;  %v1495_v62 = vsel %vm1435_vm6, %v1490_v56, %v1494_v50  ;;  %v690_v4 = vpack.c.bf16 %v658_v0, %v658_v0  ;;  %v525_v24 = vpop.f32.mrf.mxu0 }
 0x10e   : > { %1202 = vst.msk [vmem:[#allocation2 + $0x40] sm:$0xf] %vm711_vm4, %v1105_v55  ;;  %1660 = vrot.lane.b32.xlu0 %v1495_v62, %s3033_s30  ;;  %v591_v29 = vmul.f32 %v3218_v22, %v525_v24 }
 0x10f   : > { %v762_v5 = vunpack.c.l.b16 %v690_v4 }
 0x110   : > { %v627_v38 = vadd.f32 %v3227_v28, %v591_v29  ;;  %2689 = vmatmul.msk.bf16.gmra.mxu0 %vm437_vm0, %v425_v34 }
 0x111   : > { %v788_v9 = vpack.c.b16 %v762_v5, %v761_v3 }
 0x112   : > { %v659_v43 = vmax.f32 %v627_v38, 0.0  ;;  %v412_v38 = vld [vmem:[%s3185_s28 + $0xf8] sm:$0xff] }
 0x113   : > { %v1254_v7 = vld [vmem:[#allocation2 + $0x44] sm:$0xf]  ;;  %v835_v12 = vshrl.u32 %v788_v9, 16  ;;  %v838_v13 = vshll.u32 %v788_v9, 16 }
 0x114   : > { %v1404_v8 = vunpack.c.l.b16 %v1254_v7  ;;  %v691_v47 = vpack.c.bf16 %v659_v43, %v659_v43 }
 0x115   : > { %v3361_v10 = vld [vmem:[#allocation2 + $0x3c] sm:$0xff]  ;;  %v837_v18 = vrot.slane %v835_v12, 7  ;;  %v527_v45 = vpop.f32.mrf.mxu0 }
 0x116   : > { %1743 = vrot.lane.b32.xlu0 %v1691_v6, %s3032_s23  ;;  %v3364_v11 = vpack.c.b16 %v1404_v8, %v1404_v8  ;;  %v1497_v14 = vshrl.u32 %v3361_v10, 16  ;;  %v1499_v15 = vshll.u32 %v3361_v10, 16  ;;  %v592_v46 = vmul.f32 %v3218_v22, %v527_v45 }
 0x117   : > { %v840_v21 = vor.u32 %v838_v13, %v837_v18  ;;  %v967_v23 = vsel %vm3235_vm3, %v837_v18, 0  ;;  %v763_v50 = vunpack.c.l.b16 %v691_v47  ;;  %v427_v8 = vpack.c.bf16 %v410_v2, %v409_v1 }
 0x118   : > { %v1504_v17 = vshll.u32 %v3364_v11, 16  ;;  %v1501_v19 = vrot.slane %v1499_v15, 1  ;;  %v991_v26 = vsel %vm943_vm1, %v967_v23, 0  ;;  %v628_v48 = vadd.f32 %v3227_v28, %v592_v46 }
 0x119   : > { %v951_v32 = vsel %vm3235_vm3, 0, %v840_v21  ;;  %v1061_v33 = vunpack.c.l.b16 %v991_v26  ;;  %2691 = vmatmul.msk.bf16.gmra.mxu3 %vm437_vm0, %v427_v8 }
 0x11a   : > { %v1506_v20 = vrot.slane %v1504_v17, 1  ;;  %v1502_v25 = vor.u32 %v1501_v19, %v1497_v14  ;;  %v1059_v36 = vunpack.c.l.b16 %v951_v32  ;;  %v1060_v37 = vunpack.c.h.b16 %v951_v32 }
 0x11b   : > { %v1109_v39 = vpack.c.b16 %v1061_v33, %v1061_v33  ;;  %v660_v49 = vmax.f32 %v628_v48, 0.0  ;;  %v1439_v14 = vshll.u32 %v3347_v57, 16 }
 0x11c   : > { %v1507_v35 = vsel %vm1435_vm6, %v1502_v25, %v1506_v20  ;;  %v1107_v40 = vpack.c.b16 %v1059_v36, %v1059_v36  ;;  %v1108_v41 = vpack.c.b16 %v1060_v37, %v1060_v37  ;;  %v1437_v20 = vshrl.u32 %v3347_v57, 16  ;;  %v411_v37 = vld [vmem:[%s3185_s28 + $0xf0] sm:$0xff] }
 0x11d   : > { %1206 = vst.msk [vmem:[#allocation2 + $0x50] sm:$0xf] %vm711_vm4, %v1109_v39  ;;  %v692_v51 = vpack.c.bf16 %v660_v49, %v660_v49  ;;  %v530_v52 = vpop.f32.mrf.mxu0  ;;  %v1441_v21 = vrot.slane %v1439_v14, 1  ;;  %v1444_v25 = vshll.u32 %v3349_v58, 16 }
 0x11e   : > { %1662 = vrot.lane.b32.xlu0 %v1507_v35, %s3033_s30  ;;  %1204 = vst.msk [vmem:[#allocation2 + $0x48] sm:$0xf] %vm711_vm4, %v1107_v40  ;;  %v593_v54 = vmul.f32 %v3218_v22, %v530_v52 }
 0x11f   : > { %1205 = vst.msk [vmem:[#allocation2 + $0x4c] sm:$0xf] %vm711_vm4, %v1108_v41  ;;  %v764_v53 = vunpack.c.l.b16 %v692_v51  ;;  %v1442_v30 = vor.u32 %v1441_v21, %v1437_v20  ;;  %v1446_v31 = vrot.slane %v1444_v25, 1  ;;  %v428_v41 = vpack.c.bf16 %v412_v38, %v411_v37 }
 0x120   : > { %v629_v56 = vadd.f32 %v3227_v28, %v593_v54 }
 0x121   : > { %v789_v55 = vpack.c.b16 %v764_v53, %v763_v50  ;;  %v1447_v33 = vsel %vm1435_vm6, %v1442_v30, %v1446_v31 }
 0x122   : > { %v661_v62 = vmax.f32 %v629_v56, 0.0  ;;  %1652 = vrot.lane.b32.xlu2 %v1447_v33, %s3033_s30 }
 0x123   : > { %v842_v60 = vshrl.u32 %v789_v55, 16  ;;  %v845_v61 = vshll.u32 %v789_v55, 16 }
 0x124   : > { %v693_v7 = vpack.c.bf16 %v661_v62, %v661_v62  ;;  %v1257_v54 = vld [vmem:[#allocation2 + $0x50] sm:$0xf] }
 0x125   : > { %v844_v63 = vrot.slane %v842_v60, 7  ;;  %v532_v0 = vpop.f32.mrf.mxu0 }
 0x126   : > { %v594_v5 = vmul.f32 %v3218_v22, %v532_v0  ;;  %v765_v26 = vunpack.c.l.b16 %v693_v7  ;;  %v3419_v60 = vld [vmem:[#allocation2 + $0x48] sm:$0xff]  ;;  %v1705_v7 = vrot.slane %v3364_v11, 1 }
 0x127   : > { %v847_v3 = vor.u32 %v845_v61, %v844_v63  ;;  %v968_v4 = vsel %vm3235_vm3, %v844_v63, 0  ;;  %v1405_v61 = vunpack.c.l.b16 %v1257_v54 }
 0x128   : > { %v993_v6 = vsel %vm943_vm1, %v968_v4, 0  ;;  %v630_v13 = vadd.f32 %v3227_v28, %v594_v5  ;;  %v1511_v4 = vshll.u32 %v3419_v60, 16 }
 0x129   : > { %v952_v9 = vsel %vm3235_vm3, 0, %v847_v3  ;;  %v1064_v12 = vunpack.c.l.b16 %v993_v6  ;;  %2692 = vmatmul.msk.bf16.gmra.mxu3 %vm437_vm0, %v428_v41  ;;  %v3428_v3 = vpack.c.b16 %v1405_v61, %v1405_v61  ;;  %v1704_v6 = vrot.slane %v3361_v10, 1 }
 0x12a   : > { %v1062_v15 = vunpack.c.l.b16 %v952_v9  ;;  %v1063_v17 = vunpack.c.h.b16 %v952_v9  ;;  %v662_v19 = vmax.f32 %v630_v13, 0.0  ;;  %v1513_v13 = vrot.slane %v1511_v4, 1 }
 0x12b   : > { %v1112_v18 = vpack.c.b16 %v1064_v12, %v1064_v12  ;;  %v1509_v12 = vshrl.u32 %v3419_v60, 16  ;;  %v1516_v14 = vshll.u32 %v3428_v3, 16 }
 0x12c   : > { %v1110_v23 = vpack.c.b16 %v1062_v15, %v1062_v15  ;;  %v1111_v24 = vpack.c.b16 %v1063_v17, %v1063_v17  ;;  %v694_v29 = vpack.c.bf16 %v662_v19, %v662_v19  ;;  %v1706_v17 = vsel %vm1688_vm5, %v1704_v6, %v1705_v7 }
 0x12d   : > { %1209 = vst.msk [vmem:[#allocation2 + $0x5c] sm:$0xf] %vm711_vm4, %v1112_v18  ;;  %v535_v52 = vpop.f32.mrf.mxu0  ;;  %v1514_v20 = vor.u32 %v1513_v13, %v1509_v12  ;;  %v1518_v21 = vrot.slane %v1516_v14, 1 }
 0x12e   : > { %1207 = vst.msk [vmem:[#allocation2 + $0x54] sm:$0xf] %vm711_vm4, %v1110_v23  ;;  %v766_v32 = vunpack.c.l.b16 %v694_v29  ;;  %v595_v53 = vmul.f32 %v3218_v22, %v535_v52 }
 0x12f   : > { %1208 = vst.msk [vmem:[#allocation2 + $0x58] sm:$0xf] %vm711_vm4, %v1111_v24  ;;  %v1519_v31 = vsel %vm1435_vm6, %v1514_v20, %v1518_v21 }
 0x130   : > { %v790_v34 = vpack.c.b16 %v766_v32, %v765_v26  ;;  %v631_v55 = vadd.f32 %v3227_v28, %v595_v53 }
 0x132   : > { %v849_v35 = vshrl.u32 %v790_v34, 16  ;;  %v852_v36 = vshll.u32 %v790_v34, 16  ;;  %v663_v1 = vmax.f32 %v631_v55, 0.0 }
 0x134   : > { %v851_v58 = vrot.slane %v849_v35, 7  ;;  %v1260_v11 = vld [vmem:[#allocation2 + $0x5c] sm:$0xf] }
 0x135   : > { %v537_v2 = vpop.f32.mrf.mxu0 }
 0x136   : > { %v854_v39 = vor.u32 %v852_v36, %v851_v58  ;;  %v969_v40 = vsel %vm3235_vm3, %v851_v58, 0  ;;  %v596_v5 = vmul.f32 %v3218_v22, %v537_v2  ;;  %v1406_v36 = vunpack.c.l.b16 %v1260_v11 }
 0x137   : > { %v995_v43 = vsel %vm943_vm1, %v969_v40, 0 }
 0x138   : > { %v953_v45 = vsel %vm3235_vm3, 0, %v854_v39  ;;  %v1067_v46 = vunpack.c.l.b16 %v995_v43  ;;  %v632_v8 = vadd.f32 %v3227_v28, %v596_v5  ;;  %v1424_v40 = vpack.c.b16 %v1406_v36, %v1406_v36 }
 0x139   : > { %v1065_v47 = vunpack.c.l.b16 %v953_v45  ;;  %v1066_v48 = vunpack.c.h.b16 %v953_v45 }
 0x13a   : > { %v1115_v49 = vpack.c.b16 %v1067_v46, %v1067_v46  ;;  %v664_v15 = vmax.f32 %v632_v8, 0.0  ;;  %v1711_v52 = vrot.slane %v1424_v40, 1  ;;  %v1528_v14 = vshll.u32 %v1424_v40, 16 }
 0x13b   : > { %v1113_v50 = vpack.c.b16 %v1065_v47, %v1065_v47  ;;  %v1114_v51 = vpack.c.b16 %v1066_v48, %v1066_v48 }
 0x13c   : > { %1212 = vst.msk [vmem:[#allocation2 + $0x68] sm:$0xf] %vm711_vm4, %v1115_v49  ;;  %v696_v19 = vpack.c.bf16 %v664_v15, %v664_v15  ;;  %v1530_v20 = vrot.slane %v1528_v14, 1  ;;  %v2004_v14 = vld [vmem:[%s4181_s4 + $0x10] sm:$0x3] }
 0x13d   : > { %1210 = vst.msk [vmem:[#allocation2 + $0x60] sm:$0xf] %vm711_vm4, %v1113_v50 }
 0x13e   : > { %1211 = vst.msk [vmem:[#allocation2 + $0x64] sm:$0xf] %vm711_vm4, %v1114_v51  ;;  %v768_v23 = vunpack.c.l.b16 %v696_v19 }
 0x143   : > { %v1263_v37 = vld [vmem:[#allocation2 + $0x68] sm:$0xf] }
 0x144   : > { %v1407_v47 = vunpack.c.l.b16 %v1263_v37 }
 0x145   : > { %v3462_v46 = vld [vmem:[#allocation2 + $0x60] sm:$0xff] }
 0x146   : > { %v3468_v55 = vpack.c.b16 %v1407_v47, %v1407_v47  ;;  %v1533_v4 = vshrl.u32 %v3462_v46, 16 }
 0x148   : > { %v1540_v6 = vshll.u32 %v3468_v55, 16 }
 0x14d   : > { %v1746_v62 = vpop.permute.xlu1 %1745 }
 0x150   : > { %v1655_v56 = vpop.permute.xlu0 %1654 }
 0x151   : > { %v1783_v63 = vsel %vm1779_vm7, %v3254_v16, %v1655_v56  ;;  %v695_v16 = vpack.c.bf16 %v663_v1, %v663_v1  ;;  %v1535_v56 = vshll.u32 %v3462_v46, 16 }
 0x152   : > { %v3424_v0 = vsel %vm1816_vm8, %v1783_v63, %v1746_v62  ;;  %v1707_v62 = vrot.slane %v3419_v60, 1  ;;  %v1708_v63 = vrot.slane %v3428_v3, 1  ;;  %v1542_v3 = vrot.slane %v1540_v6, 1 }
 0x153   : > { %1869 = vrot.lane.b32.xlu1 %v3424_v0, %s3035_s11  ;;  %v767_v18 = vunpack.c.l.b16 %v695_v16  ;;  %v1537_v5 = vrot.slane %v1535_v56, 1 }
 0x154   : > { %v1709_v8 = vsel %vm1688_vm5, %v1707_v62, %v1708_v63 }
 0x155   : > { %v791_v24 = vpack.c.b16 %v768_v23, %v767_v18  ;;  %v1538_v12 = vor.u32 %v1537_v5, %v1533_v4 }
 0x157   : > { %v856_v32 = vshrl.u32 %v791_v24, 16  ;;  %v859_v33 = vshll.u32 %v791_v24, 16  ;;  %v1543_v18 = vsel %vm1435_vm6, %v1538_v12, %v1542_v3  ;;  %v3524_v3 = vld [vmem:[%s4179_s2] ss:$0 sm:$0xff] }
 0x158   : > { %v1659_v9 = vpop.permute.xlu2 %1658 }
 0x159   : > { %v1787_v25 = vsel %vm1779_vm7, %v3305_v42, %v1659_v9  ;;  %v858_v58 = vrot.slane %v856_v32, 7 }
 0x15b   : > { %1753 = vrot.lane.b32.xlu1 %v1706_v17, %s3032_s23  ;;  %v861_v38 = vor.u32 %v859_v33, %v858_v58  ;;  %v970_v39 = vsel %vm3235_vm3, %v858_v58, 0  ;;  %v540_v2 = vpop.f32.mrf.mxu0 }
 0x15c   : > { %v997_v41 = vsel %vm943_vm1, %v970_v39, 0  ;;  %v597_v7 = vmul.f32 %v3218_v22, %v540_v2 }
 0x15d   : > { %v1748_v34 = vpop.permute.xlu1 %1747  ;;  %v954_v43 = vsel %vm3235_vm3, 0, %v861_v38  ;;  %v1070_v45 = vunpack.c.l.b16 %v997_v41 }
 0x15e   : > { %v1068_v48 = vunpack.c.l.b16 %v954_v43  ;;  %v1069_v49 = vunpack.c.h.b16 %v954_v43  ;;  %v633_v16 = vadd.f32 %v3227_v28, %v597_v7 }
 0x15f   : > { %v1118_v50 = vpack.c.b16 %v1070_v45, %v1070_v45 }
 0x160   : > { %v1750_v26 = vpop.permute.xlu2 %1749  ;;  %v1657_v29 = vpop.permute.xlu0 %1656  ;;  %v1116_v53 = vpack.c.b16 %v1068_v48, %v1068_v48  ;;  %v1117_v54 = vpack.c.b16 %v1069_v49, %v1069_v49  ;;  %v665_v15 = vmax.f32 %v633_v16, 0.0 }
 0x161   : > { %v3442_v30 = vsel %vm1816_vm8, %v1787_v25, %v1750_v26  ;;  %v1785_v35 = vsel %vm1779_vm7, %v3275_v59, %v1657_v29  ;;  %v3457_v59 = vld [vmem:[#allocation2 + $0x54] sm:$0xff]  ;;  %1215 = vst.msk [vmem:[#allocation2 + $0x74] sm:$0xf] %vm711_vm4, %v1118_v50 }
 0x162   : > { %1904 = vrot.lane.b32.xlu0 %v3442_v30, %s3036_s27  ;;  %v3450_v42 = vsel %vm1816_vm8, %v1785_v35, %v1748_v34  ;;  %v1710_v51 = vrot.slane %v3457_v59, 1  ;;  %1213 = vst.msk [vmem:[#allocation2 + $0x6c] sm:$0xf] %vm711_vm4, %v1116_v53  ;;  %v1523_v1 = vshll.u32 %v3457_v59, 16  ;;  %v1521_v9 = vshrl.u32 %v3457_v59, 16 }
 0x163   : > { %1902 = vrot.lane.b32.xlu2 %v3450_v42, %s3036_s27  ;;  %1664 = vrot.lane.b32.xlu1 %v1519_v31, %s3033_s30  ;;  %1214 = vst.msk [vmem:[#allocation2 + $0x70] sm:$0xf] %vm711_vm4, %v1117_v54  ;;  %v542_v17 = vpop.f32.mrf.mxu0  ;;  %v697_v23 = vpack.c.bf16 %v665_v15, %v665_v15 }
 0x164   : > { %v1712_v61 = vsel %vm1688_vm5, %v1710_v51, %v1711_v52  ;;  %v1525_v13 = vrot.slane %v1523_v1, 1  ;;  %v598_v21 = vmul.f32 %v3218_v22, %v542_v17 }
 0x165   : > { %v769_v26 = vunpack.c.l.b16 %v697_v23 }
 0x166   : > { %v1526_v19 = vor.u32 %v1525_v13, %v1521_v9  ;;  %v634_v11 = vadd.f32 %v3227_v28, %v598_v21 }
 0x168   : > { %v1531_v24 = vsel %vm1435_vm6, %v1526_v19, %v1530_v20  ;;  %v666_v25 = vmax.f32 %v634_v11, 0.0  ;;  %v1266_v43 = vld [vmem:[#allocation2 + $0x74] sm:$0xf]  ;;  %v3535_v20 = vld [vmem:[%s4180_s3] ss:$0 sm:$0xff] }
 0x169   : > { %v1408_v52 = vunpack.c.l.b16 %v1266_v43 }
 0x16a   : > { %1873 = vrot.lane.b32.xlu0 %v3442_v30, %s3035_s11  ;;  %v698_v29 = vpack.c.bf16 %v666_v25, %v666_v25  ;;  %v3506_v51 = vld [vmem:[#allocation2 + $0x6c] sm:$0xff] }
 0x16b   : > { %1871 = vrot.lane.b32.xlu2 %v3450_v42, %s3035_s11  ;;  %v545_v31 = vpop.f32.mrf.mxu0  ;;  %v3513_v5 = vpack.c.b16 %v1408_v52, %v1408_v52  ;;  %v1547_v6 = vshll.u32 %v3506_v51, 16  ;;  %v1545_v15 = vshrl.u32 %v3506_v51, 16 }
 0x16c   : > { %v770_v32 = vunpack.c.l.b16 %v698_v29  ;;  %v599_v33 = vmul.f32 %v3218_v22, %v545_v31 }
 0x16d   : > { %v1552_v17 = vshll.u32 %v3513_v5, 16 }
 0x16e   : > { %v792_v58 = vpack.c.b16 %v770_v32, %v769_v26  ;;  %v635_v37 = vadd.f32 %v3227_v28, %v599_v33 }
 0x16f   : > { %v1554_v31 = vrot.slane %v1552_v17, 1 }
 0x170   : > { %v863_v39 = vshrl.u32 %v792_v58, 16  ;;  %v866_v40 = vshll.u32 %v792_v58, 16  ;;  %v667_v45 = vmax.f32 %v635_v37, 0.0 }
 0x172   : > { %1757 = vrot.lane.b32.xlu0 %v1712_v61, %s3032_s23  ;;  %v865_v41 = vrot.slane %v863_v39, 7  ;;  %v699_v56 = vpack.c.bf16 %v667_v45, %v667_v45 }
 0x173   : > { %1755 = vrot.lane.b32.xlu2 %v1709_v8, %s3032_s23  ;;  %v547_v47 = vpop.f32.mrf.mxu0  ;;  %v1713_v8 = vrot.slane %v3462_v46, 1 }
 0x174   : > { %v868_v48 = vor.u32 %v866_v40, %v865_v41  ;;  %v971_v49 = vsel %vm3235_vm3, %v865_v41, 0  ;;  %v771_v7 = vunpack.c.l.b16 %v699_v56 }
 0x175   : > { %v999_v50 = vsel %vm943_vm1, %v971_v49, 0  ;;  %v560_v26 = vpop.f32.mrf.mxu3 }
 0x176   : > { %v955_v53 = vsel %vm3235_vm3, 0, %v868_v48  ;;  %v1073_v54 = vunpack.c.l.b16 %v999_v50  ;;  %v605_v32 = vmul.f32 %v3524_v3, %v560_v26 }
 0x177   : > { %v1071_v62 = vunpack.c.l.b16 %v955_v53  ;;  %v1072_v63 = vunpack.c.h.b16 %v955_v53 }
 0x178   : > { %v1121_v1 = vpack.c.b16 %v1073_v54, %v1073_v54  ;;  %v641_v43 = vadd.f32 %v3535_v20, %v605_v32 }
 0x179   : > { %v1120_v4 = vpack.c.b16 %v1072_v63, %v1072_v63 }
 0x17a   : > { %1668 = vrot.lane.b32.xlu0 %v1543_v18, %s3033_s30  ;;  %1218 = vst.msk [vmem:[#allocation2 + $0x80] sm:$0xf] %vm711_vm4, %v1121_v1  ;;  %v2014_v18 = vunpack.c.l.b16 %v2004_v14  ;;  %v673_v63 = vmax.f32 %v641_v43, 0.0 }
 0x17b   : > { %1666 = vrot.lane.b32.xlu2 %v1531_v24, %s3033_s30  ;;  %1217 = vst.msk [vmem:[#allocation2 + $0x7c] sm:$0xf] %vm711_vm4, %v1120_v4 }
 0x17c   : > { %v2017_v11 = vpack.c.b16 %v2014_v18, %v2014_v18 }
 0x17d   : > { %v1752_v35 = vpop.permute.xlu1 %1751  ;;  %v550_v9 = vpop.f32.mrf.mxu0 }
 0x17e   : > { %v601_v13 = vmul.f32 %v3524_v3, %v550_v9  ;;  %v2055_v33 = vsel %vm2053_vm9, %v2017_v11, 0 }
 0x17f   : > { %2062 = vmatpush.bf16.msra.mxu1 %v2055_v33  ;;  %2834 = vmatpush.bf16.msrb.mxu3 %v2055_v33 }
 0x180   : > { %v1661_v34 = vpop.permute.xlu0 %1660  ;;  %v637_v21 = vadd.f32 %v3535_v20, %v601_v13 }
 0x181   : > { %v1789_v36 = vsel %vm1779_vm7, %v3330_v27, %v1661_v34  ;;  %v600_v27 = vmul.f32 %v3218_v22, %v547_v47  ;;  %v1119_v22 = vpack.c.b16 %v1071_v62, %v1071_v62 }
 0x182   : > { %v3498_v38 = vsel %vm1816_vm8, %v1789_v36, %v1752_v35  ;;  %v669_v35 = vmax.f32 %v637_v21, 0.0 }
 0x183   : > { %1906 = vrot.lane.b32.xlu1 %v3498_v38, %s3036_s27  ;;  %v636_v61 = vadd.f32 %v3227_v28, %v600_v27  ;;  %v1714_v28 = vrot.slane %v3468_v55, 1  ;;  %1216 = vst.msk [vmem:[#allocation2 + $0x78] sm:$0xf] %vm711_vm4, %v1119_v22  ;;  %v1549_v55 = vrot.slane %v1547_v6, 1  ;;  %v562_v22 = vpop.f32.mrf.mxu3 }
 0x184   : > { %v701_v48 = vpack.c.bf16 %v669_v35, %v669_v35 }
 0x185   : > { %v668_v2 = vmax.f32 %v636_v61, 0.0  ;;  %v1715_v23 = vsel %vm1688_vm5, %v1713_v8, %v1714_v28  ;;  %v1550_v29 = vor.u32 %v1549_v55, %v1545_v15  ;;  %v552_v36 = vpop.f32.mrf.mxu0  ;;  %v705_v28 = vpack.c.bf16 %v673_v63, %v673_v63 }
 0x186   : > { %v602_v39 = vmul.f32 %v3524_v3, %v552_v36  ;;  %v773_v61 = vunpack.c.l.b16 %v701_v48 }
 0x187   : > { %v700_v16 = vpack.c.bf16 %v668_v2, %v668_v2  ;;  %v1555_v40 = vsel %vm1435_vm6, %v1550_v29, %v1554_v31  ;;  %v2831_v2 = vld [vmem:[%s4181_s4 + $0x8] sm:$0xff]  ;;  %v777_v17 = vunpack.c.l.b16 %v705_v28 }
 0x188   : > { %v638_v49 = vadd.f32 %v3535_v20, %v602_v39  ;;  %2063 = vmatpush.bf16.msra.mxu1 %v2831_v2  ;;  %2835 = vmatpush.bf16.msrb.mxu3 %v2831_v2 }
 0x189   : > { %v772_v12 = vunpack.c.l.b16 %v700_v16  ;;  %v2830_v16 = vld [vmem:[%s4181_s4] sm:$0xff] }
 0x18a   : > { %v670_v53 = vmax.f32 %v638_v49, 0.0 }
 0x18b   : > { %1875 = vrot.lane.b32.xlu1 %v3498_v38, %s3035_s11  ;;  %v793_v19 = vpack.c.b16 %v772_v12, %v771_v7  ;;  %v606_v7 = vmul.f32 %v3524_v3, %v562_v22 }
 0x18c   : > { %v702_v62 = vpack.c.bf16 %v670_v53, %v670_v53  ;;  %2064 = vmatpush.bf16.msra.mxu1 %v2830_v16  ;;  %2836 = vmatpush.bf16.msrb.mxu3 %v2830_v16 }
 0x18d   : > { %v870_v24 = vshrl.u32 %v793_v19, 16  ;;  %v873_v25 = vshll.u32 %v793_v19, 16  ;;  %v555_v1 = vpop.f32.mrf.mxu0  ;;  %v642_v9 = vadd.f32 %v3535_v20, %v606_v7 }
 0x18e   : > { %v774_v4 = vunpack.c.l.b16 %v702_v62  ;;  %v603_v6 = vmul.f32 %v3524_v3, %v555_v1 }
 0x18f   : > { %v872_v34 = vrot.slane %v870_v24, 7  ;;  %v674_v15 = vmax.f32 %v642_v9, 0.0 }
 0x190   : > { %v794_v8 = vpack.c.b16 %v774_v4, %v773_v61  ;;  %v639_v12 = vadd.f32 %v3535_v20, %v603_v6 }
 0x191   : > { %v875_v58 = vor.u32 %v873_v25, %v872_v34  ;;  %v972_v37 = vsel %vm3235_vm3, %v872_v34, 0  ;;  %v706_v18 = vpack.c.bf16 %v674_v15, %v674_v15 }
 0x192   : > { %v1001_v41 = vsel %vm943_vm1, %v972_v37, 0  ;;  %v877_v13 = vshrl.u32 %v794_v8, 16  ;;  %v880_v14 = vshll.u32 %v794_v8, 16  ;;  %v671_v19 = vmax.f32 %v639_v12, 0.0  ;;  %v1653_v8 = vpop.permute.xlu2 %1652 }
 0x193   : > { %1759 = vrot.lane.b32.xlu1 %v1715_v23, %s3032_s23  ;;  %v956_v45 = vsel %vm3235_vm3, 0, %v875_v58  ;;  %v1076_v47 = vunpack.c.l.b16 %v1001_v41  ;;  %v778_v11 = vunpack.c.l.b16 %v706_v18 }
 0x194   : > { %v1074_v27 = vunpack.c.l.b16 %v956_v45  ;;  %v1075_v50 = vunpack.c.h.b16 %v956_v45  ;;  %v879_v55 = vrot.slane %v877_v13, 7  ;;  %v703_v35 = vpack.c.bf16 %v671_v19, %v671_v19 }
 0x195   : > { %v1124_v52 = vpack.c.b16 %v1076_v47, %v1076_v47  ;;  %v557_v24 = vpop.f32.mrf.mxu0  ;;  %v796_v32 = vpack.c.b16 %v778_v11, %v777_v17  ;;  %v1744_v11 = vpop.permute.xlu0 %1743 }
 0x196   : > { %v1122_v54 = vpack.c.b16 %v1074_v27, %v1074_v27  ;;  %v1123_v56 = vpack.c.b16 %v1075_v50, %v1075_v50  ;;  %v882_v21 = vor.u32 %v880_v14, %v879_v55  ;;  %v973_v23 = vsel %vm3235_vm3, %v879_v55, 0 }
 0x197   : > { %1221 = vst.msk [vmem:[#allocation2 + $0x8c] sm:$0xf] %vm711_vm4, %v1124_v52  ;;  %v1003_v25 = vsel %vm943_vm1, %v973_v23, 0  ;;  %v604_v26 = vmul.f32 %v3524_v3, %v557_v24  ;;  %v891_v37 = vshrl.u32 %v796_v32, 16  ;;  %v894_v39 = vshll.u32 %v796_v32, 16 }
 0x198   : > { %1219 = vst.msk [vmem:[#allocation2 + $0x84] sm:$0xf] %vm711_vm4, %v1122_v54  ;;  %v957_v29 = vsel %vm3235_vm3, 0, %v882_v21  ;;  %v1079_v31 = vunpack.c.l.b16 %v1003_v25  ;;  %v775_v47 = vunpack.c.l.b16 %v703_v35  ;;  %v1781_v24 = vsel %vm1779_vm7, %v3347_v57, %v1653_v8 }
 0x199   : > { %1220 = vst.msk [vmem:[#allocation2 + $0x88] sm:$0xf] %vm711_vm4, %v1123_v56  ;;  %v1077_v33 = vunpack.c.l.b16 %v957_v29  ;;  %v1078_v34 = vunpack.c.h.b16 %v957_v29  ;;  %v640_v36 = vadd.f32 %v3535_v20, %v604_v26  ;;  %v893_v45 = vrot.slane %v891_v37, 7 }
 0x19a   : > { %v1127_v58 = vpack.c.b16 %v1079_v31, %v1079_v31  ;;  %v1818_v31 = vsel %vm1816_vm8, %v1781_v24, %v1744_v11 }
 0x19b   : > { %1670 = vrot.lane.b32.xlu1 %v1555_v40, %s3033_s30  ;;  %v1125_v40 = vpack.c.b16 %v1077_v33, %v1077_v33  ;;  %v1126_v41 = vpack.c.b16 %v1078_v34, %v1078_v34  ;;  %v672_v43 = vmax.f32 %v640_v36, 0.0  ;;  %v896_v49 = vor.u32 %v894_v39, %v893_v45 }
 0x19c   : > { %1224 = vst.msk [vmem:[#allocation2 + $0x98] sm:$0xf] %vm711_vm4, %v1127_v58  ;;  %v975_v27 = vsel %vm3235_vm3, %v893_v45, 0  ;;  %v565_v9 = vpop.f32.mrf.mxu3 }
 0x19d   : > { %1222 = vst.msk [vmem:[#allocation2 + $0x90] sm:$0xf] %vm711_vm4, %v1125_v40  ;;  %v704_v48 = vpack.c.bf16 %v672_v43, %v672_v43  ;;  %v1007_v50 = vsel %vm943_vm1, %v975_v27, 0  ;;  %v959_v53 = vsel %vm3235_vm3, 0, %v896_v49  ;;  %v607_v14 = vmul.f32 %v3524_v3, %v565_v9  ;;  %v1663_v43 = vpop.permute.xlu0 %1662 }
 0x19e   : > { %1223 = vst.msk [vmem:[#allocation2 + $0x94] sm:$0xf] %vm711_vm4, %v1126_v41  ;;  %v1085_v54 = vunpack.c.l.b16 %v1007_v50  ;;  %v1083_v56 = vunpack.c.l.b16 %v959_v53  ;;  %v1084_v61 = vunpack.c.h.b16 %v959_v53  ;;  %v1791_v49 = vsel %vm1779_vm7, %v3361_v10, %v1663_v43  ;;  %v1272_v44 = vld [vmem:[#allocation2 + $0x8c] sm:$0xf] }
 0x19f   : > { %v776_v52 = vunpack.c.l.b16 %v704_v48  ;;  %v643_v18 = vadd.f32 %v3535_v20, %v607_v14 }
 0x1a0   : > { %v1133_v63 = vpack.c.b16 %v1085_v54, %v1085_v54  ;;  %v1131_v1 = vpack.c.b16 %v1083_v56, %v1083_v56  ;;  %v1132_v2 = vpack.c.b16 %v1084_v61, %v1084_v61  ;;  %v1269_v54 = vld [vmem:[#allocation2 + $0x80] sm:$0xf] }
 0x1a1   : > { %v795_v62 = vpack.c.b16 %v776_v52, %v775_v47  ;;  %v675_v23 = vmax.f32 %v643_v18, 0.0  ;;  %v1409_v10 = vunpack.c.l.b16 %v1269_v54 }
 0x1a2   : > { %1230 = vst.msk [vmem:[#allocation2 + $0xb0] sm:$0xf] %vm711_vm4, %v1133_v63 }
 0x1a3   : > { %v884_v22 = vshrl.u32 %v795_v62, 16  ;;  %v887_v4 = vshll.u32 %v795_v62, 16  ;;  %1228 = vst.msk [vmem:[#allocation2 + $0xa8] sm:$0xf] %vm711_vm4, %v1131_v1  ;;  %v707_v32 = vpack.c.bf16 %v675_v23, %v675_v23 }
 0x1a4   : > { %1229 = vst.msk [vmem:[#allocation2 + $0xac] sm:$0xf] %vm711_vm4, %v1132_v2  ;;  %v567_v25 = vpop.f32.mrf.mxu3  ;;  %v3612_v2 = vld [vmem:[#allocation2 + $0x78] sm:$0xff] }
 0x1a5   : > { %v886_v6 = vrot.slane %v884_v22, 7  ;;  %v608_v26 = vmul.f32 %v3524_v3, %v567_v25  ;;  %v779_v37 = vunpack.c.l.b16 %v707_v32 }
 0x1a7   : > { %v889_v7 = vor.u32 %v887_v4, %v886_v6  ;;  %v974_v16 = vsel %vm3235_vm3, %v886_v6, 0  ;;  %v644_v33 = vadd.f32 %v3535_v20, %v608_v26 }
 0x1a8   : > { %v1005_v28 = vsel %vm943_vm1, %v974_v16, 0 }
 0x1a9   : > { %v958_v12 = vsel %vm3235_vm3, 0, %v889_v7  ;;  %v1082_v13 = vunpack.c.l.b16 %v1005_v28  ;;  %v676_v35 = vmax.f32 %v644_v33, 0.0  ;;  %v1281_v26 = vld [vmem:[#allocation2 + $0xb0] sm:$0xf]  ;;  %v1716_v33 = vrot.slane %v3506_v51, 1 }
 0x1aa   : > { %v1080_v15 = vunpack.c.l.b16 %v958_v12  ;;  %v1081_v55 = vunpack.c.h.b16 %v958_v12 }
 0x1ab   : > { %v1130_v17 = vpack.c.b16 %v1082_v13, %v1082_v13  ;;  %v708_v57 = vpack.c.bf16 %v676_v35, %v676_v35  ;;  %v3642_v35 = vld [vmem:[#allocation2 + $0xa8] sm:$0xff] }
 0x1ac   : > { %v1128_v19 = vpack.c.b16 %v1080_v15, %v1080_v15  ;;  %v1129_v21 = vpack.c.b16 %v1081_v55, %v1081_v55  ;;  %v570_v39 = vpop.f32.mrf.mxu3  ;;  %v3619_v15 = vpack.c.b16 %v1409_v10, %v1409_v10  ;;  %v1559_v55 = vshll.u32 %v3612_v2, 16 }
 0x1ad   : > { %1227 = vst.msk [vmem:[#allocation2 + $0xa4] sm:$0xf] %vm711_vm4, %v1130_v17  ;;  %v780_v40 = vunpack.c.l.b16 %v708_v57  ;;  %v609_v41 = vmul.f32 %v3524_v3, %v570_v39 }
 0x1ae   : > { %1225 = vst.msk [vmem:[#allocation2 + $0x9c] sm:$0xf] %vm711_vm4, %v1128_v19  ;;  %v1720_v54 = vrot.slane %v3619_v15, 1 }
 0x1af   : > { %1226 = vst.msk [vmem:[#allocation2 + $0xa0] sm:$0xf] %vm711_vm4, %v1129_v21  ;;  %v797_v45 = vpack.c.b16 %v780_v40, %v779_v37  ;;  %v645_v47 = vadd.f32 %v3535_v20, %v609_v41 }
 0x1b1   : > { %v898_v50 = vshrl.u32 %v797_v45, 16  ;;  %v901_v52 = vshll.u32 %v797_v45, 16  ;;  %v677_v61 = vmax.f32 %v645_v47, 0.0 }
 0x1b3   : > { %v900_v56 = vrot.slane %v898_v50, 7  ;;  %v709_v8 = vpack.c.bf16 %v677_v61, %v677_v61 }
 0x1b4   : > { %v572_v62 = vpop.f32.mrf.mxu3  ;;  %v1278_v32 = vld [vmem:[#allocation2 + $0xa4] sm:$0xf] }
 0x1b5   : > { %v903_v63 = vor.u32 %v901_v52, %v900_v56  ;;  %v976_v1 = vsel %vm3235_vm3, %v900_v56, 0  ;;  %v610_v22 = vmul.f32 %v3524_v3, %v572_v62  ;;  %v781_v24 = vunpack.c.l.b16 %v709_v8 }
 0x1b6   : > { %v1009_v4 = vsel %vm943_vm1, %v976_v1, 0  ;;  %v3646_v57 = vld [vmem:[#allocation2 + $0x9c] sm:$0xff]  ;;  %v1412_v39 = vunpack.c.l.b16 %v1278_v32  ;;  %v1719_v52 = vrot.slane %v3612_v2, 1  ;;  %v1605_v1 = vshrl.u32 %v3642_v35, 16 }
 0x1b7   : > { %v960_v7 = vsel %vm3235_vm3, 0, %v903_v63  ;;  %v1088_v16 = vunpack.c.l.b16 %v1009_v4  ;;  %v646_v28 = vadd.f32 %v3535_v20, %v610_v22 }
 0x1b8   : > { %v1086_v9 = vunpack.c.l.b16 %v960_v7  ;;  %v1087_v12 = vunpack.c.h.b16 %v960_v7  ;;  %v1430_v56 = vpack.c.b16 %v1412_v39, %v1412_v39 }
 0x1b9   : > { %v1136_v14 = vpack.c.b16 %v1088_v16, %v1088_v16  ;;  %v678_v17 = vmax.f32 %v646_v28, 0.0 }
 0x1ba   : > { %v1134_v21 = vpack.c.b16 %v1086_v9, %v1086_v9  ;;  %v1135_v23 = vpack.c.b16 %v1087_v12, %v1087_v12 }
 0x1bb   : > { %1233 = vst.msk [vmem:[#allocation2 + $0xbc] sm:$0xf] %vm711_vm4, %v1136_v14  ;;  %v710_v25 = vpack.c.bf16 %v678_v17, %v678_v17 }
 0x1bc   : > { %1231 = vst.msk [vmem:[#allocation2 + $0xb4] sm:$0xf] %vm711_vm4, %v1134_v21 }
 0x1bd   : > { %v1903_v29 = vpop.permute.xlu2 %1902  ;;  %1232 = vst.msk [vmem:[#allocation2 + $0xb8] sm:$0xf] %vm711_vm4, %v1135_v23 }
 0x1c2   : > { %v1284_v32 = vld [vmem:[#allocation2 + $0xbc] sm:$0xf] }
 0x1c5   : > { %v1870_v34 = vpop.permute.xlu1 %1869  ;;  %v1872_v48 = vpop.permute.xlu2 %1871 }
 0x1c6   : > { %v1936_v36 = vsel %vm1934_vm10, %v1818_v31, %v1870_v34  ;;  %v1938_v3 = vsel %vm1934_vm10, %v3424_v0, %v1872_v48  ;;  %v1561_v0 = vrot.slane %v1559_v55, 1  ;;  %v782_v31 = vunpack.c.l.b16 %v710_v25 }
 0x1c7   : > { %v1969_v58 = vsel %vm1967_vm11, %v1936_v36, %v1903_v29  ;;  %v1564_v29 = vshll.u32 %v3619_v15, 16  ;;  %v1717_v34 = vrot.slane %v3513_v5, 1  ;;  %v1413_v36 = vunpack.c.l.b16 %v1281_v26 }
 0x1c8   : > { %2773 = vmatmul.msk.bf16.vlgmr.msra.gmra.mxu1 %vm2020_vm12, %v1969_v58  ;;  %v798_v37 = vpack.c.b16 %v782_v31, %v781_v24  ;;  %v1600_v15 = vshll.u32 %v1430_v56, 16  ;;  %v1721_v55 = vsel %vm1688_vm5, %v1719_v52, %v1720_v54  ;;  %v3681_v24 = vld [vmem:[#allocation2 + $0x84] sm:$0xff]  ;;  %v1410_v25 = vunpack.c.l.b16 %v1272_v44 }
 0x1c9   : > { %v1566_v41 = vrot.slane %v1564_v29, 1  ;;  %v1718_v47 = vsel %vm1688_vm5, %v1716_v33, %v1717_v34  ;;  %v3649_v48 = vpack.c.b16 %v1413_v36, %v1413_v36  ;;  %v1728_v29 = vrot.slane %v3646_v57, 1 }
 0x1ca   : > { %v905_v43 = vshrl.u32 %v798_v37, 16  ;;  %v908_v45 = vshll.u32 %v798_v37, 16  ;;  %v1602_v23 = vrot.slane %v1600_v15, 1  ;;  %v1729_v31 = vrot.slane %v1430_v56, 1 }
 0x1cb   : > { %v1612_v4 = vshll.u32 %v3649_v48, 16  ;;  %v1569_v33 = vshrl.u32 %v3681_v24, 16 }
 0x1cc   : > { %v907_v5 = vrot.slane %v905_v43, 7  ;;  %v1414_v43 = vunpack.c.l.b16 %v1284_v32 }
 0x1cd   : > { %v1754_v27 = vpop.permute.xlu1 %1753  ;;  %v1756_v18 = vpop.permute.xlu2 %1755 }
 0x1ce   : > { %v3606_v53 = vsel %vm1816_vm8, %v1791_v49, %v1754_v27  ;;  %v1607_v49 = vshll.u32 %v3642_v35, 16  ;;  %v1595_v27 = vshll.u32 %v3646_v57, 16  ;;  %v910_v62 = vor.u32 %v908_v45, %v907_v5 }
 0x1cf   : > { %1908 = vrot.lane.b32.xlu2 %v3606_v53, %s3036_s27  ;;  %v977_v63 = vsel %vm3235_vm3, %v907_v5, 0  ;;  %v1722_v5 = vrot.slane %v3681_v24, 1 }
 0x1d0   : > { %v1011_v10 = vsel %vm943_vm1, %v977_v63, 0  ;;  %v1609_v22 = vrot.slane %v1607_v49, 1  ;;  %v961_v8 = vsel %vm3235_vm3, 0, %v910_v62  ;;  %v1597_v9 = vrot.slane %v1595_v27, 1  ;;  %v1275_v63 = vld [vmem:[#allocation2 + $0x98] sm:$0xf] }
 0x1d1   : > { %v1091_v28 = vunpack.c.l.b16 %v1011_v10  ;;  %v1090_v14 = vunpack.c.h.b16 %v961_v8 }
 0x1d3   : > { %v1139_v17 = vpack.c.b16 %v1091_v28, %v1091_v28  ;;  %v3710_v28 = vld [vmem:[#allocation2 + $0x90] sm:$0xff] }
 0x1d4   : > { %v1905_v6 = vpop.permute.xlu0 %1904 }
 0x1d5   : > { %v1665_v13 = vpop.permute.xlu1 %1664  ;;  %v1971_v20 = vsel %vm1967_vm11, %v1938_v3, %v1905_v6  ;;  %v1667_v50 = vpop.permute.xlu2 %1666  ;;  %v1593_v6 = vshrl.u32 %v3646_v57, 16  ;;  %1236 = vst.msk [vmem:[#allocation2 + $0xc8] sm:$0xf] %vm711_vm4, %v1139_v17 }
 0x1d6   : > { %v1793_v19 = vsel %vm1779_vm7, %v3419_v60, %v1665_v13  ;;  %v1557_v60 = vshrl.u32 %v3612_v2, 16  ;;  %v1795_v7 = vsel %vm1779_vm7, %v3457_v59, %v1667_v50  ;;  %v1089_v13 = vunpack.c.l.b16 %v961_v8 }
 0x1d7   : > { %1877 = vrot.lane.b32.xlu2 %v3606_v53, %s3035_s11  ;;  %v3630_v11 = vsel %vm1816_vm8, %v1793_v19, %v1756_v18  ;;  %v1138_v59 = vpack.c.b16 %v1090_v14, %v1090_v14  ;;  %v1610_v18 = vor.u32 %v1609_v22, %v1605_v1  ;;  %v1614_v19 = vrot.slane %v1612_v4, 1 }
 0x1d8   : > { %2774 = vmatmul.msk.bf16.gmra.mxu1 %vm2020_vm12, %v1971_v20  ;;  %1910 = vrot.lane.b32.xlu0 %v3630_v11, %s3036_s27  ;;  %v1562_v40 = vor.u32 %v1561_v0, %v1557_v60  ;;  %v1137_v3 = vpack.c.b16 %v1089_v13, %v1089_v13  ;;  %v1598_v21 = vor.u32 %v1597_v9, %v1593_v6  ;;  %v1571_v0 = vshll.u32 %v3681_v24, 16 }
 0x1d9   : > { %1235 = vst.msk [vmem:[#allocation2 + $0xc4] sm:$0xf] %vm711_vm4, %v1138_v59  ;;  %v1615_v20 = vsel %vm1435_vm6, %v1610_v18, %v1614_v19  ;;  %v1428_v60 = vpack.c.b16 %v1410_v25, %v1410_v25  ;;  %v1411_v22 = vunpack.c.l.b16 %v1275_v63  ;;  %v1731_v59 = vrot.slane %v3642_v35, 1  ;;  %v3771_v63 = vld [vmem:[%s4183_s6] ss:$0 sm:$0xff] }
 0x1da   : > { %v1567_v61 = vsel %vm1435_vm6, %v1562_v40, %v1566_v41  ;;  %1234 = vst.msk [vmem:[#allocation2 + $0xc0] sm:$0xf] %vm711_vm4, %v1137_v3  ;;  %v1603_v26 = vsel %vm1435_vm6, %v1598_v21, %v1602_v23  ;;  %v1573_v34 = vrot.slane %v1571_v0, 1  ;;  %v1730_v40 = vsel %vm1688_vm5, %v1728_v29, %v1729_v31  ;;  %v3693_v41 = vld [vmem:[#allocation2 + $0xb4] sm:$0xff] }
 0x1db   : > { %v1576_v36 = vshll.u32 %v1428_v60, 16  ;;  %v1619_v27 = vshll.u32 %v3693_v41, 16  ;;  %v1617_v56 = vshrl.u32 %v3693_v41, 16  ;;  %v1429_v9 = vpack.c.b16 %v1411_v22, %v1411_v22 }
 0x1dc   : > { %v3644_v58 = vpop.permute.xlu0 %1873  ;;  %v1287_v6 = vld [vmem:[#allocation2 + $0xc8] sm:$0xf]  ;;  %v1732_v18 = vrot.slane %v3649_v48, 1  ;;  %v1734_v48 = vrot.slane %v3693_v41, 1 }
 0x1dd   : > { %v1940_v37 = vsel %vm1934_vm10, %v3450_v42, %v3644_v58  ;;  %v1578_v49 = vrot.slane %v1576_v36, 1  ;;  %v1723_v42 = vrot.slane %v1428_v60, 1  ;;  %v1432_v58 = vpack.c.b16 %v1414_v43, %v1414_v43  ;;  %v2266_v36 = vld [vmem:[%s4184_s7] sm:$0x3] }
 0x1de   : > { %v1415_v14 = vunpack.c.l.b16 %v1287_v6 }
 0x1df   : > { %1761 = vrot.lane.b32.xlu2 %v1718_v47, %s3032_s23  ;;  %v1574_v47 = vor.u32 %v1573_v34, %v1569_v33  ;;  %v1724_v54 = vsel %vm1688_vm5, %v1722_v5, %v1723_v42  ;;  %v1624_v62 = vshll.u32 %v1432_v58, 16  ;;  %v1735_v0 = vrot.slane %v1432_v58, 1 }
 0x1e0   : > { %1879 = vrot.lane.b32.xlu0 %v3630_v11, %s3035_s11  ;;  %v1433_v17 = vpack.c.b16 %v1415_v14, %v1415_v14  ;;  %v1588_v5 = vshll.u32 %v1429_v9, 16  ;;  %v1290_v14 = vld [vmem:[#allocation2 + $0xd4] sm:$0xf] }
 0x1e1   : > { %v1579_v50 = vsel %vm1435_vm6, %v1574_v47, %v1578_v49  ;;  %v1626_v10 = vrot.slane %v1624_v62, 1  ;;  %v3712_v13 = vld [vmem:[#allocation2 + $0xc0] sm:$0xff]  ;;  %v1736_v29 = vsel %vm1688_vm5, %v1734_v48, %v1735_v0  ;;  %v1581_v47 = vshrl.u32 %v3710_v28, 16 }
 0x1e2   : > { %v1631_v3 = vshll.u32 %v3712_v13, 16  ;;  %v1629_v44 = vshrl.u32 %v3712_v13, 16  ;;  %v1636_v23 = vshll.u32 %v1433_v17, 16  ;;  %v1737_v42 = vrot.slane %v3712_v13, 1 }
 0x1e3   : > { %v1738_v58 = vrot.slane %v1433_v17, 1  ;;  %v1416_v17 = vunpack.c.l.b16 %v1290_v14 }
 0x1e4   : > { %v1758_v16 = vpop.permute.xlu0 %1757  ;;  %v1633_v21 = vrot.slane %v1631_v3, 1 }
 0x1e5   : > { %v3670_v12 = vsel %vm1816_vm8, %v1795_v7, %v1758_v16 }
 0x1e6   : > { %1912 = vrot.lane.b32.xlu1 %v3670_v12, %s3036_s27  ;;  %v1634_v25 = vor.u32 %v1633_v21, %v1629_v44 }
 0x1e7   : > { %1672 = vrot.lane.b32.xlu2 %v1567_v61, %s3033_s30  ;;  %v1621_v61 = vrot.slane %v1619_v27, 1 }
 0x1e8   : > { %1763 = vrot.lane.b32.xlu0 %v1721_v55, %s3032_s23  ;;  %v1725_v55 = vrot.slane %v3710_v28, 1 }
 0x1e9   : > { %v1622_v1 = vor.u32 %v1621_v61, %v1617_v56  ;;  %v3763_v56 = vld [vmem:[%s4182_s5] ss:$0 sm:$0xff] }
 0x1eb   : > { %v1627_v8 = vsel %vm1435_vm6, %v1622_v1, %v1626_v10 }
 0x1ec   : > { %v1669_v4 = vpop.permute.xlu0 %1668 }
 0x1ed   : > { %v1797_v7 = vsel %vm1779_vm7, %v3462_v46, %v1669_v4  ;;  %v1726_v46 = vrot.slane %v1429_v9, 1 }
 0x1ee   : > { %1680 = vrot.lane.b32.xlu1 %v1615_v20, %s3033_s30  ;;  %v1733_v20 = vsel %vm1688_vm5, %v1731_v59, %v1732_v18  ;;  %v3779_v18 = vld [vmem:[#allocation2 + $0xcc] sm:$0xff] }
 0x1ef   : > { %1678 = vrot.lane.b32.xlu2 %v1603_v26, %s3033_s30  ;;  %v1727_v19 = vsel %vm1688_vm5, %v1725_v55, %v1726_v46  ;;  %v1638_v26 = vrot.slane %v1636_v23, 1 }
 0x1f1   : > { %v1639_v60 = vsel %vm1435_vm6, %v1634_v25, %v1638_v26 }
 0x1f5   : > { %v1907_v39 = vpop.permute.xlu1 %1906 }
 0x1f6   : > { %1881 = vrot.lane.b32.xlu1 %v3670_v12, %s3035_s11  ;;  %v1973_v45 = vsel %vm1967_vm11, %v1940_v37, %v1907_v39  ;;  %v2316_v37 = vsel %vm2053_vm9, %v2266_v36, 0 }
 0x1f7   : > { %2775 = vmatmul.msk.bf16.gmra.mxu1 %vm2020_vm12, %v1973_v45  ;;  %1769 = vrot.lane.b32.xlu2 %v1730_v40, %s3032_s23  ;;  %v1583_v40 = vshll.u32 %v3710_v28, 16 }
 0x1f8   : > { %2325 = vmatpush.bf16.msra.mxu2 %v2316_v37  ;;  %2837 = vmatpush.bf16.msra.mxu3 %v2316_v37 }
 0x1f9   : > { %v1585_v49 = vrot.slane %v1583_v40, 1 }
 0x1fb   : > { %v1586_v27 = vor.u32 %v1585_v49, %v1581_v47 }
 0x1fd   : > { %v1876_v52 = vpop.permute.xlu1 %1875 }
 0x1fe   : > { %1674 = vrot.lane.b32.xlu1 %v1579_v50, %s3033_s30  ;;  %v1942_v31 = vsel %vm1934_vm10, %v3442_v30, %v1876_v52  ;;  %v1590_v50 = vrot.slane %v1588_v5, 1 }
 0x1ff   : > { %1765 = vrot.lane.b32.xlu2 %v1724_v54, %s3032_s23 }
 0x200   : > { %v1591_v52 = vsel %vm1435_vm6, %v1586_v27, %v1590_v50 }
 0x205   : > { %v1760_v16 = vpop.permute.xlu1 %1759 }
 0x206   : > { %v3715_v15 = vsel %vm1816_vm8, %v1797_v7, %v1760_v16 }
 0x207   : > { %1914 = vrot.lane.b32.xlu0 %v3715_v15, %s3036_s27  ;;  %1682 = vrot.lane.b32.xlu2 %v1627_v8, %s3033_s30 }
 0x20d   : > { %v1671_v39 = vpop.permute.xlu1 %1670 }
 0x20e   : > { %v1799_v30 = vsel %vm1779_vm7, %v3506_v51, %v1671_v39  ;;  %v1739_v51 = vsel %vm1688_vm5, %v1737_v42, %v1738_v58 }
 0x20f   : > { %1771 = vrot.lane.b32.xlu0 %v1733_v20, %s3032_s23  ;;  %1767 = vrot.lane.b32.xlu2 %v1727_v19, %s3032_s23  ;;  %v1434_v19 = vpack.c.b16 %v1416_v17, %v1416_v17 }
 0x217   : > { %1883 = vrot.lane.b32.xlu0 %v3715_v15, %s3035_s11  ;;  %1684 = vrot.lane.b32.xlu2 %v1639_v60, %s3033_s30  ;;  %v1740_v60 = vrot.slane %v3779_v18, 1 }
 0x21f   : > { %1773 = vrot.lane.b32.xlu0 %v1736_v29, %s3032_s23 }
 0x229   : > { %v1909_v32 = vpop.permute.xlu2 %1908 }
 0x22a   : > { %v1975_v33 = vsel %vm1967_vm11, %v1942_v31, %v1909_v32 }
 0x22b   : > { %2776 = vmatmul.msk.bf16.gmra.mxu1 %vm2020_vm12, %v1975_v33 }
 0x231   : > { %v1878_v34 = vpop.permute.xlu2 %1877 }
 0x232   : > { %v1944_v61 = vsel %vm1934_vm10, %v3498_v38, %v1878_v34 }
 0x239   : > { %v1762_v43 = vpop.permute.xlu2 %1761 }
 0x23a   : > { %v3748_v45 = vsel %vm1816_vm8, %v1799_v30, %v1762_v43 }
 0x23b   : > { %1885 = vrot.lane.b32.xlu0 %v3748_v45, %s3035_s11  ;;  %1916 = vrot.lane.b32.xlu1 %v3748_v45, %s3036_s27 }
 0x241   : > { %v1673_v22 = vpop.permute.xlu2 %1672 }
 0x242   : > { %v1801_v44 = vsel %vm1779_vm7, %v3612_v2, %v1673_v22 }
 0x243   : > { %1775 = vrot.lane.b32.xlu0 %v1739_v51, %s3032_s23  ;;  %1676 = vrot.lane.b32.xlu1 %v1591_v52, %s3033_s30  ;;  %v1643_v51 = vshll.u32 %v3779_v18, 16 }
 0x245   : > { %v2066_v54 = vpop.f32.mrf.mxu1 }
 0x246   : > { %v2150_v62 = vmul.f32 %v3763_v56, %v2066_v54 }
 0x248   : > { %v2186_v6 = vadd.f32 %v3771_v63, %v2150_v62  ;;  %v1641_v62 = vshrl.u32 %v3779_v18, 16 }
 0x249   : > { %v1679_v3 = vpop.permute.xlu2 %1678 }
 0x24a   : > { %v1911_v1 = vpop.permute.xlu0 %1910  ;;  %v2218_v16 = vmax.f32 %v2186_v6, 0.0  ;;  %v1807_v37 = vsel %vm1779_vm7, %v3646_v57, %v1679_v3 }
 0x24b   : > { %v1977_v10 = vsel %vm1967_vm11, %v1944_v61, %v1911_v1  ;;  %v1645_v1 = vrot.slane %v1643_v51, 1 }
 0x24c   : > { %2777 = vmatmul.msk.bf16.gmra.mxu1 %vm2020_vm12, %v1977_v10 }
 0x24d   : > { %v2068_v4 = vpop.f32.mrf.mxu1 }
 0x24e   : > { %v2151_v7 = vmul.f32 %v3763_v56, %v2068_v4 }
 0x250   : > { %v2187_v38 = vadd.f32 %v3771_v63, %v2151_v7 }
 0x251   : > { %v1770_v32 = vpop.permute.xlu2 %1769 }
 0x252   : > { %v2219_v8 = vmax.f32 %v2187_v38, 0.0  ;;  %v1880_v9 = vpop.permute.xlu0 %1879  ;;  %v3803_v39 = vsel %vm1816_vm8, %v1807_v37, %v1770_v32 }
 0x253   : > { %v1946_v21 = vsel %vm1934_vm10, %v3606_v53, %v1880_v9  ;;  %v1741_v53 = vrot.slane %v1434_v19, 1 }
 0x254   : > { %v2250_v55 = vpack.c.bf16 %v2219_v8, %v2218_v16  ;;  %v1646_v16 = vor.u32 %v1645_v1, %v1641_v62 }
 0x255   : > { %v2071_v46 = vpop.f32.mrf.mxu1  ;;  %v1742_v33 = vsel %vm1688_vm5, %v1740_v60, %v1741_v53 }
 0x256   : > { %2789 = vmatmul.msk.bf16.vlgmr.msra.gmra.mxu2 %vm1779_vm7, %v2250_v55  ;;  %v2152_v23 = vmul.f32 %v3763_v56, %v2071_v46 }
 0x258   : > { %v1913_v59 = vpop.permute.xlu1 %1912  ;;  %v2188_v48 = vadd.f32 %v3771_v63, %v2152_v23 }
 0x259   : > { %v1979_v25 = vsel %vm1967_vm11, %v1946_v21, %v1913_v59  ;;  %v1766_v47 = vpop.permute.xlu2 %1765 }
 0x25a   : > { %v1764_v20 = vpop.permute.xlu0 %1763  ;;  %v2220_v34 = vmax.f32 %v2188_v48, 0.0 }
 0x25b   : > { %v3788_v26 = vsel %vm1816_vm8, %v1801_v44, %v1764_v20 }
 0x25c   : > { %2778 = vmatmul.msk.bf16.gmra.mxu1 %vm2020_vm12, %v1979_v25  ;;  %1887 = vrot.lane.b32.xlu0 %v3788_v26, %s3035_s11 }
 0x25d   : > { %1918 = vrot.lane.b32.xlu1 %v3788_v26, %s3036_s27  ;;  %v2073_v2 = vpop.f32.mrf.mxu1 }
 0x25e   : > { %v2153_v0 = vmul.f32 %v3763_v56, %v2073_v2 }
 0x260   : > { %v1681_v29 = vpop.permute.xlu1 %1680  ;;  %v2189_v31 = vadd.f32 %v3771_v63, %v2153_v0 }
 0x261   : > { %v1809_v10 = vsel %vm1779_vm7, %v3642_v35, %v1681_v29  ;;  %v1683_v14 = vpop.permute.xlu2 %1682 }
 0x262   : > { %v2221_v36 = vmax.f32 %v2189_v31, 0.0  ;;  %v1811_v55 = vsel %vm1779_vm7, %v3693_v41, %v1683_v14 }
 0x264   : > { %v2251_v40 = vpack.c.bf16 %v2221_v36, %v2220_v34  ;;  %1777 = vrot.lane.b32.xlu0 %v1742_v33, %s3032_s23 }
 0x265   : > { %1893 = vrot.lane.b32.xlu1 %v3803_v39, %s3035_s11 }
 0x266   : > { %2790 = vmatmul.msk.bf16.gmra.mxu2 %vm1779_vm7, %v2251_v40 }
 0x268   : > { %v1882_v30 = vpop.permute.xlu1 %1881 }
 0x269   : > { %v1948_v42 = vsel %vm1934_vm10, %v3630_v11, %v1882_v30  ;;  %v1648_v11 = vshll.u32 %v1434_v19, 16  ;;  %v1768_v3 = vpop.permute.xlu2 %1767 }
 0x26b   : > { %v1650_v8 = vrot.slane %v1648_v11, 1 }
 0x26d   : > { %v1651_v9 = vsel %vm1435_vm6, %v1646_v16, %v1650_v8 }
 0x270   : > { %v1675_v43 = vpop.permute.xlu1 %1674 }
 0x271   : > { %v1803_v49 = vsel %vm1779_vm7, %v3681_v24, %v1675_v43  ;;  %v1685_v60 = vpop.permute.xlu2 %1684 }
 0x272   : > { %v3812_v5 = vsel %vm1816_vm8, %v1803_v49, %v1766_v47  ;;  %v1813_v48 = vsel %vm1779_vm7, %v3712_v13, %v1685_v60 }
 0x273   : > { %1889 = vrot.lane.b32.xlu0 %v3812_v5, %s3035_s11  ;;  %1920 = vrot.lane.b32.xlu1 %v3812_v5, %s3036_s27 }
 0x274   : > { %v2076_v57 = vpop.f32.mrf.mxu1 }
 0x275   : > { %v2154_v58 = vmul.f32 %v3763_v56, %v2076_v57 }
 0x277   : > { %v2190_v52 = vadd.f32 %v3771_v63, %v2154_v58 }
 0x279   : > { %v1915_v27 = vpop.permute.xlu0 %1914  ;;  %v2222_v22 = vmax.f32 %v2190_v52, 0.0 }
 0x27a   : > { %v1981_v50 = vsel %vm1967_vm11, %v1948_v42, %v1915_v27  ;;  %v3881_v27 = vld [vmem:[%s4185_s8] ss:$0 sm:$0xff] }
 0x27b   : > { %2779 = vmatmul.msk.bf16.gmra.mxu1 %vm2020_vm12, %v1981_v50  ;;  %v3886_v50 = vld [vmem:[%s4186_s9] ss:$0 sm:$0xff] }
 0x27c   : > { %v2078_v24 = vpop.f32.mrf.mxu1 }
 0x27d   : > { %v2155_v54 = vmul.f32 %v3763_v56, %v2078_v24 }
 0x27f   : > { %v2191_v61 = vadd.f32 %v3771_v63, %v2155_v54 }
 0x281   : > { %v2223_v4 = vmax.f32 %v2191_v61, 0.0  ;;  %v1772_v6 = vpop.permute.xlu0 %1771 }
 0x282   : > { %v3831_v7 = vsel %vm1816_vm8, %v1809_v10, %v1772_v6 }
 0x283   : > { %1926 = vrot.lane.b32.xlu2 %v3831_v7, %s3036_s27  ;;  %1895 = vrot.lane.b32.xlu1 %v3831_v7, %s3035_s11  ;;  %v2252_v38 = vpack.c.bf16 %v2223_v4, %v2222_v22  ;;  %v2900_v4 = vld [vmem:[%s3185_s28] sm:$0xff] }
 0x285   : > { %2791 = vmatmul.msk.bf16.gmra.mxu2 %vm1779_vm7, %v2252_v38 }
 0x289   : > { %v1884_v35 = vpop.permute.xlu0 %1883 }
 0x28a   : > { %v1950_v19 = vsel %vm1934_vm10, %v3670_v12, %v1884_v35 }
 0x28b   : > { %1686 = vrot.lane.b32.xlu2 %v1651_v9, %s3033_s30  ;;  %s2978_s30 = scalar_lea.hbm %s2977_s29, 256 }
 0x28c   : > { %p2979_p6 = scmp.ne.s32.totalorder %s2977_s29, %s2978_s30  ;;  %p2984_p1 = scmp.lt.s32.totalorder %s2982_s26, %s2978_s30 }
 0x28e   : > { %p2980_p9 = pnand %p2979_p6, %p3143_p11  ;;  %p2985_p3 = por %p2984_p1, %p2983_p0 }
 0x290   : > { %p2981_p13 = pneg %p2980_p9 }
 0x291   : > { %v1774_v46 = vpop.permute.xlu0 %1773 }
 0x292   : > { %v3843_v17 = vsel %vm1816_vm8, %v1811_v55, %v1774_v46  ;;  %p2986_p4 = pnand %p2985_p3, %p2981_p13 }
 0x293   : > { %1928 = vrot.lane.b32.xlu2 %v3843_v17, %s3036_s27 }
 0x29b   : > { %1897 = vrot.lane.b32.xlu2 %v3843_v17, %s3035_s11 }
 0x2a3   : > { %1924 = vrot.lane.b32.xlu2 %v3803_v39, %s3036_s27 }
 0x2a8   : > { %v2081_v59 = vpop.f32.mrf.mxu1 }
 0x2a9   : > { %v2156_v41 = vmul.f32 %v3763_v56, %v2081_v59 }
 0x2ab   : > { %v2192_v25 = vadd.f32 %v3771_v63, %v2156_v41 }
 0x2ad   : > { %v1886_v44 = vpop.permute.xlu0 %1885  ;;  %v1917_v21 = vpop.permute.xlu1 %1916  ;;  %v2224_v12 = vmax.f32 %v2192_v25, 0.0 }
 0x2ae   : > { %v1983_v23 = vsel %vm1967_vm11, %v1950_v19, %v1917_v21 }
 0x2af   : > { %2780 = vmatmul.msk.bf16.gmra.mxu1 %vm2020_vm12, %v1983_v23 }
 0x2b0   : > { %v2083_v20 = vpop.f32.mrf.mxu1 }
 0x2b1   : > { %v2157_v2 = vmul.f32 %v3763_v56, %v2083_v20  ;;  %v2901_v20 = vld [vmem:[%s3185_s28 + $0x8] sm:$0xff] }
 0x2b3   : > { %v2193_v53 = vadd.f32 %v3771_v63, %v2157_v2 }
 0x2b5   : > { %v2225_v0 = vmax.f32 %v2193_v53, 0.0  ;;  %v1776_v29 = vpop.permute.xlu0 %1775  ;;  %v1677_v31 = vpop.permute.xlu1 %1676 }
 0x2b6   : > { %v1805_v32 = vsel %vm1779_vm7, %v3710_v28, %v1677_v31  ;;  %v1850_v33 = vsel %vm1816_vm8, %v1813_v48, %v1776_v29  ;;  %v1952_v28 = vsel %vm1934_vm10, %v3715_v15, %v1886_v44  ;;  %v2902_v29 = vld [vmem:[%s3185_s28 + $0x10] sm:$0xff] }
 0x2b7   : > { %1930 = vrot.lane.b32.xlu0 %v1850_v33, %s3036_s27  ;;  %v1842_v34 = vsel %vm1816_vm8, %v1805_v32, %v1768_v3  ;;  %v2253_v36 = vpack.c.bf16 %v2225_v0, %v2224_v12 }
 0x2b8   : > { %1922 = vrot.lane.b32.xlu1 %v1842_v34, %s3036_s27 }
 0x2b9   : > { %2792 = vmatmul.msk.bf16.gmra.mxu2 %vm1779_vm7, %v2253_v36 }
 0x2bf   : > { %1899 = vrot.lane.b32.xlu0 %v1850_v33, %s3035_s11 }
 0x2c0   : > { %1891 = vrot.lane.b32.xlu1 %v1842_v34, %s3035_s11 }
 0x2c9   : > { %v2086_v13 = vpop.f32.mrf.mxu1 }
 0x2ca   : > { %v2158_v37 = vmul.f32 %v3763_v56, %v2086_v13 }
 0x2cc   : > { %v2194_v47 = vadd.f32 %v3771_v63, %v2158_v37 }
 0x2ce   : > { %v2226_v42 = vmax.f32 %v2194_v47, 0.0  ;;  %v1888_v10 = vpop.permute.xlu0 %1887 }
 0x2cf   : > { %v1919_v40 = vpop.permute.xlu1 %1918  ;;  %v1954_v55 = vsel %vm1934_vm10, %v3748_v45, %v1888_v10 }
 0x2d0   : > { %v1985_v30 = vsel %vm1967_vm11, %v1952_v28, %v1919_v40  ;;  %v2903_v28 = vld [vmem:[%s3185_s28 + $0x18] sm:$0xff] }
 0x2d1   : > { %2781 = vmatmul.msk.bf16.gmra.mxu1 %vm2020_vm12, %v1985_v30  ;;  %v2088_v43 = vpop.f32.mrf.mxu1 }
 0x2d2   : > { %v2159_v49 = vmul.f32 %v3763_v56, %v2088_v43 }
 0x2d4   : > { %v2195_v57 = vadd.f32 %v3771_v63, %v2159_v49 }
 0x2d6   : > { %v2227_v58 = vmax.f32 %v2195_v57, 0.0  ;;  %v1778_v21 = vpop.permute.xlu0 %1777 }
 0x2d7   : > { %v1894_v15 = vpop.permute.xlu1 %1893 }
 0x2d8   : > { %v2254_v24 = vpack.c.bf16 %v2227_v58, %v2226_v42  ;;  %v1960_v61 = vsel %vm1934_vm10, %v1842_v34, %v1894_v15 }
 0x2d9   : > { %v2091_v51 = vpop.f32.mrf.mxu1  ;;  %v2327_v52 = vpop.f32.mrf.mxu2 }
 0x2da   : > { %v2411_v54 = vmul.f32 %v3881_v27, %v2327_v52  ;;  %2793 = vmatmul.msk.bf16.gmra.mxu2 %vm1779_vm7, %v2254_v24  ;;  %v2160_v22 = vmul.f32 %v3763_v56, %v2091_v51 }
 0x2dc   : > { %v2447_v62 = vadd.f32 %v3886_v50, %v2411_v54  ;;  %v2196_v9 = vadd.f32 %v3771_v63, %v2160_v22 }
 0x2dd   : > { %v1927_v1 = vpop.permute.xlu2 %1926 }
 0x2de   : > { %v1993_v11 = vsel %vm1967_vm11, %v1960_v61, %v1927_v1  ;;  %v2479_v6 = vadd.f32 %v2900_v4, %v2447_v62  ;;  %v2228_v44 = vmax.f32 %v2196_v9, 0.0  ;;  %v2904_v62 = vld [vmem:[%s3185_s28 + $0x20] sm:$0xff] }
 0x2df   : > { %2785 = vmatmul.msk.bf16.vlgmr.msrb.gmra.mxu3 %vm2020_vm12, %v1993_v11 }
 0x2e0   : > { %v2511_v38 = vmax.f32 %v2479_v6, 0.0  ;;  %v2905_v6 = vld [vmem:[%s3185_s28 + $0x28] sm:$0xff] }
 0x2e1   : > { %v2093_v16 = vpop.f32.mrf.mxu1  ;;  %v2329_v8 = vpop.f32.mrf.mxu2 }
 0x2e2   : > { %2543 = vst.msk [vmem:[%s3899_s15] sm:$0xff] %vm437_vm0, %v2511_v38  ;;  %v2161_v35 = vmul.f32 %v3763_v56, %v2093_v16  ;;  %v2412_v14 = vmul.f32 %v3881_v27, %v2329_v8 }
 0x2e4   : > { %v2197_v46 = vadd.f32 %v3771_v63, %v2161_v35  ;;  %v2448_v3 = vadd.f32 %v3886_v50, %v2412_v14 }
 0x2e5   : > { %v1921_v59 = vpop.permute.xlu1 %1920  ;;  %v1687_v19 = vpop.permute.xlu2 %1686 }
 0x2e6   : > { %v1987_v41 = vsel %vm1967_vm11, %v1954_v55, %v1921_v59  ;;  %v2229_v23 = vmax.f32 %v2197_v46, 0.0  ;;  %v2480_v25 = vadd.f32 %v2901_v20, %v2448_v3  ;;  %v1815_v2 = vsel %vm1779_vm7, %v3779_v18, %v1687_v19  ;;  %v1890_v8 = vpop.permute.xlu0 %1889 }
 0x2e7   : > { %2782 = vmatmul.msk.bf16.gmra.mxu1 %vm2020_vm12, %v1987_v41  ;;  %v1852_v45 = vsel %vm1816_vm8, %v1815_v2, %v1778_v21  ;;  %v1956_v55 = vsel %vm1934_vm10, %v3788_v26, %v1890_v8 }
 0x2e8   : > { %v2512_v60 = vmax.f32 %v2480_v25, 0.0  ;;  %1932 = vrot.lane.b32.xlu1 %v1852_v45, %s3036_s27  ;;  %v2255_v53 = vpack.c.bf16 %v2229_v23, %v2228_v44 }
 0x2e9   : > { %v2332_v48 = vpop.f32.mrf.mxu2 }
 0x2ea   : > { %2544 = vst.msk [vmem:[%s3899_s15 + $0x8] sm:$0xff] %vm437_vm0, %v2512_v60  ;;  %v2413_v12 = vmul.f32 %v3881_v27, %v2332_v48  ;;  %2794 = vmatmul.msk.bf16.gmra.mxu2 %vm1779_vm7, %v2255_v53 }
 0x2ec   : > { %v2449_v0 = vadd.f32 %v3886_v50, %v2413_v12 }
 0x2ed   : > { %v1929_v13 = vpop.permute.xlu2 %1928 }
 0x2ee   : > { %v2481_v18 = vadd.f32 %v2902_v29, %v2449_v0  ;;  %v2906_v29 = vld [vmem:[%s3185_s28 + $0x30] sm:$0xff] }
 0x2f0   : > { %v2513_v31 = vmax.f32 %v2481_v18, 0.0 }
 0x2f1   : > { %v2334_v32 = vpop.f32.mrf.mxu2 }
 0x2f2   : > { %2545 = vst.msk [vmem:[%s3899_s15 + $0x10] sm:$0xff] %vm437_vm0, %v2513_v31  ;;  %v2414_v33 = vmul.f32 %v3881_v27, %v2334_v32 }
 0x2f4   : > { %v2450_v34 = vadd.f32 %v3886_v50, %v2414_v33 }
 0x2f5   : > { %v1896_v36 = vpop.permute.xlu1 %1895  ;;  %v1898_v9 = vpop.permute.xlu2 %1897 }
 0x2f6   : > { %v1962_v37 = vsel %vm1934_vm10, %v3803_v39, %v1896_v36  ;;  %v2482_v40 = vadd.f32 %v2903_v28, %v2450_v34  ;;  %v1964_v35 = vsel %vm1934_vm10, %v3831_v7, %v1898_v9  ;;  %v2907_v34 = vld [vmem:[%s3185_s28 + $0x38] sm:$0xff]  ;;  %v2909_v9 = vld [vmem:[%s3185_s28 + $0x48] sm:$0xff] }
 0x2f7   : > { %v1995_v30 = vsel %vm1967_vm11, %v1962_v37, %v1929_v13 }
 0x2f8   : > { %v2096_v43 = vpop.f32.mrf.mxu1  ;;  %2786 = vmatmul.msk.bf16.gmra.mxu3 %vm2020_vm12, %v1995_v30  ;;  %v2514_v47 = vmax.f32 %v2482_v40, 0.0 }
 0x2f9   : > { %v2162_v49 = vmul.f32 %v3763_v56, %v2096_v43 }
 0x2fa   : > { %2546 = vst.msk [vmem:[%s3899_s15 + $0x18] sm:$0xff] %vm437_vm0, %v2514_v47 }
 0x2fb   : > { %v2198_v42 = vadd.f32 %v3771_v63, %v2162_v49 }
 0x2fd   : > { %v2230_v15 = vmax.f32 %v2198_v42, 0.0  ;;  %v1925_v45 = vpop.permute.xlu2 %1924 }
 0x300   : > { %v2098_v57 = vpop.f32.mrf.mxu1 }
 0x301   : > { %v2163_v58 = vmul.f32 %v3763_v56, %v2098_v57 }
 0x303   : > { %v2199_v39 = vadd.f32 %v3771_v63, %v2163_v58 }
 0x305   : > { %v2231_v24 = vmax.f32 %v2199_v39, 0.0 }
 0x307   : > { %v2256_v51 = vpack.c.bf16 %v2231_v24, %v2230_v15 }
 0x308   : > { %v2337_v52 = vpop.f32.mrf.mxu2 }
 0x309   : > { %v2415_v54 = vmul.f32 %v3881_v27, %v2337_v52  ;;  %2795 = vmatmul.msk.bf16.gmra.mxu2 %vm1779_vm7, %v2256_v51 }
 0x30b   : > { %v2451_v61 = vadd.f32 %v3886_v50, %v2415_v54 }
 0x30d   : > { %v2483_v1 = vadd.f32 %v2904_v62, %v2451_v61  ;;  %v2908_v62 = vld [vmem:[%s3185_s28 + $0x40] sm:$0xff] }
 0x30f   : > { %v2515_v11 = vmax.f32 %v2483_v1, 0.0 }
 0x310   : > { %v2339_v10 = vpop.f32.mrf.mxu2 }
 0x311   : > { %2547 = vst.msk [vmem:[%s3899_s15 + $0x20] sm:$0xff] %vm437_vm0, %v2515_v11  ;;  %v2416_v22 = vmul.f32 %v3881_v27, %v2339_v10 }
 0x313   : > { %v2452_v4 = vadd.f32 %v3886_v50, %v2416_v22 }
 0x315   : > { %v2484_v38 = vadd.f32 %v2905_v6, %v2452_v4 }
 0x317   : > { %v2516_v16 = vmax.f32 %v2484_v38, 0.0 }
 0x319   : > { %2548 = vst.msk [vmem:[%s3899_s15 + $0x28] sm:$0xff] %vm437_vm0, %v2516_v16 }
 0x329   : > { %v1931_v14 = vpop.permute.xlu0 %1930 }
 0x32a   : > { %v1923_v46 = vpop.permute.xlu1 %1922  ;;  %v1997_v3 = vsel %vm1967_vm11, %v1964_v35, %v1931_v14 }
 0x32b   : > { %2787 = vmatmul.msk.bf16.gmra.mxu3 %vm2020_vm12, %v1997_v3  ;;  %v1989_v59 = vsel %vm1967_vm11, %v1956_v55, %v1923_v46 }
 0x32c   : > { %v2101_v19 = vpop.f32.mrf.mxu1  ;;  %2783 = vmatmul.msk.bf16.gmra.mxu1 %vm2020_vm12, %v1989_v59 }
 0x32d   : > { %v2164_v41 = vmul.f32 %v3763_v56, %v2101_v19 }
 0x32f   : > { %v2200_v7 = vadd.f32 %v3771_v63, %v2164_v41 }
 0x331   : > { %v2232_v25 = vmax.f32 %v2200_v7, 0.0  ;;  %v1900_v30 = vpop.permute.xlu0 %1899 }
 0x332   : > { %v1892_v21 = vpop.permute.xlu1 %1891  ;;  %v1966_v57 = vsel %vm1934_vm10, %v3843_v17, %v1900_v30 }
 0x333   : > { %v1958_v20 = vsel %vm1934_vm10, %v3812_v5, %v1892_v21 }
 0x334   : > { %v2103_v44 = vpop.f32.mrf.mxu1  ;;  %v1991_v60 = vsel %vm1967_vm11, %v1958_v20, %v1925_v45  ;;  %v2910_v45 = vld [vmem:[%s3185_s28 + $0x50] sm:$0xff] }
 0x335   : > { %v2165_v23 = vmul.f32 %v3763_v56, %v2103_v44 }
 0x337   : > { %v2201_v26 = vadd.f32 %v3771_v63, %v2165_v23 }
 0x339   : > { %v2233_v2 = vmax.f32 %v2201_v26, 0.0 }
 0x33b   : > { %v2257_v53 = vpack.c.bf16 %v2233_v2, %v2232_v25 }
 0x33c   : > { %2784 = vmatmul.msk.bf16.gmra.mxu1 %vm2020_vm12, %v1991_v60  ;;  %v2342_v48 = vpop.f32.mrf.mxu2 }
 0x33d   : > { %v2417_v12 = vmul.f32 %v3881_v27, %v2342_v48  ;;  %2796 = vmatmul.msk.bf16.gmra.mxu2 %vm1779_vm7, %v2257_v53 }
 0x33f   : > { %v2453_v0 = vadd.f32 %v3886_v50, %v2417_v12 }
 0x341   : > { %v2485_v18 = vadd.f32 %v2906_v29, %v2453_v0 }
 0x343   : > { %v2517_v5 = vmax.f32 %v2485_v18, 0.0  ;;  %v2911_v18 = vld [vmem:[%s3185_s28 + $0x58] sm:$0xff] }
 0x344   : > { %v2344_v31 = vpop.f32.mrf.mxu2 }
 0x345   : > { %2549 = vst.msk [vmem:[%s3899_s15 + $0x30] sm:$0xff] %vm437_vm0, %v2517_v5  ;;  %v2418_v32 = vmul.f32 %v3881_v27, %v2344_v31 }
 0x347   : > { %v2454_v33 = vadd.f32 %v3886_v50, %v2418_v32 }
 0x349   : > { %v2486_v36 = vadd.f32 %v2907_v34, %v2454_v33 }
 0x34b   : > { %v2518_v13 = vmax.f32 %v2486_v36, 0.0 }
 0x34d   : > { %2550 = vst.msk [vmem:[%s3899_s15 + $0x38] sm:$0xff] %vm437_vm0, %v2518_v13 }
 0x34e   : > { %v2106_v37 = vpop.f32.mrf.mxu1 }
 0x34f   : > { %v2166_v28 = vmul.f32 %v3763_v56, %v2106_v37 }
 0x351   : > { %v2202_v43 = vadd.f32 %v3771_v63, %v2166_v28 }
 0x353   : > { %v2234_v58 = vmax.f32 %v2202_v43, 0.0 }
 0x356   : > { %v2108_v40 = vpop.f32.mrf.mxu1 }
 0x357   : > { %v2167_v47 = vmul.f32 %v3763_v56, %v2108_v40 }
 0x359   : > { %v2203_v49 = vadd.f32 %v3771_v63, %v2167_v47 }
 0x35a   : > { %v1933_v42 = vpop.permute.xlu1 %1932 }
 0x35b   : > { %v2235_v39 = vmax.f32 %v2203_v49, 0.0  ;;  %v1999_v15 = vsel %vm1967_vm11, %v1966_v57, %v1933_v42  ;;  %v2912_v57 = vld [vmem:[%s3185_s28 + $0x60] sm:$0xff] }
 0x35c   : > { %2788 = vmatmul.msk.bf16.gmra.mxu3 %vm2020_vm12, %v1999_v15 }
 0x35d   : > { %v2347_v24 = vpop.f32.mrf.mxu2  ;;  %v2258_v51 = vpack.c.bf16 %v2235_v39, %v2234_v58 }
 0x35e   : > { %v2419_v52 = vmul.f32 %v3881_v27, %v2347_v24 }
 0x35f   : > { %2797 = vmatmul.msk.bf16.gmra.mxu2 %vm1779_vm7, %v2258_v51  ;;  %v2913_v51 = vld [vmem:[%s3185_s28 + $0x68] sm:$0xff] }
 0x360   : > { %v2455_v54 = vadd.f32 %v3886_v50, %v2419_v52 }
 0x362   : > { %v2126_v61 = vpop.f32.mrf.mxu3  ;;  %v2487_v17 = vadd.f32 %v2908_v62, %v2455_v54 }
 0x363   : > { %v2174_v22 = vmul.f32 %v3763_v56, %v2126_v61 }
 0x364   : > { %v2111_v1 = vpop.f32.mrf.mxu1  ;;  %v2519_v11 = vmax.f32 %v2487_v17, 0.0 }
 0x365   : > { %v2349_v10 = vpop.f32.mrf.mxu2  ;;  %v2168_v6 = vmul.f32 %v3763_v56, %v2111_v1  ;;  %v2210_v8 = vadd.f32 %v3771_v63, %v2174_v22 }
 0x366   : > { %2551 = vst.msk [vmem:[%s3899_s15 + $0x40] sm:$0xff] %vm437_vm0, %v2519_v11  ;;  %v2420_v4 = vmul.f32 %v3881_v27, %v2349_v10 }
 0x367   : > { %v2204_v46 = vadd.f32 %v3771_v63, %v2168_v6  ;;  %v2242_v44 = vmax.f32 %v2210_v8, 0.0 }
 0x368   : > { %v2456_v38 = vadd.f32 %v3886_v50, %v2420_v4 }
 0x369   : > { %v2236_v26 = vmax.f32 %v2204_v46, 0.0 }
 0x36a   : > { %v2128_v16 = vpop.f32.mrf.mxu3  ;;  %v2488_v35 = vadd.f32 %v2909_v9, %v2456_v38 }
 0x36b   : > { %v2175_v14 = vmul.f32 %v3763_v56, %v2128_v16 }
 0x36c   : > { %v2113_v55 = vpop.f32.mrf.mxu1  ;;  %v2520_v3 = vmax.f32 %v2488_v35, 0.0 }
 0x36d   : > { %v2211_v59 = vadd.f32 %v3771_v63, %v2175_v14  ;;  %v2169_v19 = vmul.f32 %v3763_v56, %v2113_v55  ;;  %v2352_v41 = vpop.f32.mrf.mxu2 }
 0x36e   : > { %2552 = vst.msk [vmem:[%s3899_s15 + $0x48] sm:$0xff] %vm437_vm0, %v2520_v3  ;;  %v2421_v23 = vmul.f32 %v3881_v27, %v2352_v41 }
 0x36f   : > { %v2243_v7 = vmax.f32 %v2211_v59, 0.0  ;;  %v2205_v21 = vadd.f32 %v3771_v63, %v2169_v19 }
 0x370   : > { %v2457_v2 = vadd.f32 %v3886_v50, %v2421_v23 }
 0x371   : > { %v4003_v20 = vpack.c.bf16 %v2243_v7, %v2242_v44  ;;  %v2237_v25 = vmax.f32 %v2205_v21, 0.0 }
 0x372   : > { %v2489_v60 = vadd.f32 %v2910_v45, %v2457_v2  ;;  %v2914_v2 = vld [vmem:[%s3185_s28 + $0x70] sm:$0xff] }
 0x373   : > { %v2259_v53 = vpack.c.bf16 %v2237_v25, %v2236_v26 }
 0x374   : > { %v2521_v48 = vmax.f32 %v2489_v60, 0.0 }
 0x375   : > { %2798 = vmatmul.msk.bf16.gmra.mxu2 %vm1779_vm7, %v2259_v53  ;;  %v2354_v12 = vpop.f32.mrf.mxu2 }
 0x376   : > { %2553 = vst.msk [vmem:[%s3899_s15 + $0x50] sm:$0xff] %vm437_vm0, %v2521_v48  ;;  %v2422_v0 = vmul.f32 %v3881_v27, %v2354_v12 }
 0x378   : > { %v2458_v29 = vadd.f32 %v3886_v50, %v2422_v0 }
 0x37a   : > { %v2490_v5 = vadd.f32 %v2911_v18, %v2458_v29 }
 0x37b   : > { %v2131_v31 = vpop.f32.mrf.mxu3 }
 0x37c   : > { %v2522_v32 = vmax.f32 %v2490_v5, 0.0  ;;  %v2176_v33 = vmul.f32 %v3763_v56, %v2131_v31  ;;  %v2915_v5 = vld [vmem:[%s3185_s28 + $0x78] sm:$0xff] }
 0x37e   : > { %2554 = vst.msk [vmem:[%s3899_s15 + $0x58] sm:$0xff] %vm437_vm0, %v2522_v32  ;;  %v2212_v36 = vadd.f32 %v3771_v63, %v2176_v33 }
 0x380   : > { %v2244_v28 = vmax.f32 %v2212_v36, 0.0 }
 0x383   : > { %v2133_v34 = vpop.f32.mrf.mxu3 }
 0x384   : > { %v2177_v13 = vmul.f32 %v3763_v56, %v2133_v34 }
 0x386   : > { %v2213_v37 = vadd.f32 %v3771_v63, %v2177_v13 }
 0x388   : > { %v2245_v40 = vmax.f32 %v2213_v37, 0.0 }
 0x38a   : > { %v2263_v30 = vpack.c.bf16 %v2245_v40, %v2244_v28  ;;  %v2916_v28 = vld [vmem:[%s3185_s28 + $0x80] sm:$0xff] }
 0x38c   : > { %v2357_v43 = vpop.f32.mrf.mxu2  ;;  %2802 = vmatmul.msk.bf16.vlgmr.msra.gmra.mxu3 %vm1779_vm7, %v2263_v30 }
 0x38d   : > { %v2423_v47 = vmul.f32 %v3881_v27, %v2357_v43 }
 0x38f   : > { %v2459_v49 = vadd.f32 %v3886_v50, %v2423_v47 }
 0x391   : > { %v2491_v42 = vadd.f32 %v2912_v57, %v2459_v49 }
 0x393   : > { %v2523_v58 = vmax.f32 %v2491_v42, 0.0 }
 0x394   : > { %v2359_v39 = vpop.f32.mrf.mxu2 }
 0x395   : > { %2555 = vst.msk [vmem:[%s3899_s15 + $0x60] sm:$0xff] %vm437_vm0, %v2523_v58  ;;  %v2424_v15 = vmul.f32 %v3881_v27, %v2359_v39 }
 0x397   : > { %v2460_v24 = vadd.f32 %v3886_v50, %v2424_v15 }
 0x399   : > { %v2492_v52 = vadd.f32 %v2913_v51, %v2460_v24  ;;  %v2917_v51 = vld [vmem:[%s3185_s28 + $0x88] sm:$0xff] }
 0x39b   : > { %v2524_v54 = vmax.f32 %v2492_v52, 0.0 }
 0x39d   : > { %2556 = vst.msk [vmem:[%s3899_s15 + $0x68] sm:$0xff] %vm437_vm0, %v2524_v54 }
 0x3a9   : > { %v2116_v61 = vpop.f32.mrf.mxu1 }
 0x3aa   : > { %v2170_v62 = vmul.f32 %v3763_v56, %v2116_v61 }
 0x3ac   : > { %v2206_v11 = vadd.f32 %v3771_v63, %v2170_v62  ;;  %v2918_v62 = vld [vmem:[%s3185_s28 + $0x90] sm:$0xff] }
 0x3ae   : > { %v2136_v17 = vpop.f32.mrf.mxu3  ;;  %v2238_v6 = vmax.f32 %v2206_v11, 0.0 }
 0x3af   : > { %v2178_v22 = vmul.f32 %v3763_v56, %v2136_v17 }
 0x3b1   : > { %v2118_v1 = vpop.f32.mrf.mxu1  ;;  %v2214_v8 = vadd.f32 %v3771_v63, %v2178_v22 }
 0x3b2   : > { %v2171_v10 = vmul.f32 %v3763_v56, %v2118_v1 }
 0x3b3   : > { %v2246_v46 = vmax.f32 %v2214_v8, 0.0 }
 0x3b4   : > { %v2207_v4 = vadd.f32 %v3771_v63, %v2171_v10 }
 0x3b6   : > { %v2239_v38 = vmax.f32 %v2207_v4, 0.0  ;;  %v2138_v16 = vpop.f32.mrf.mxu3  ;;  %v2919_v4 = vld [vmem:[%s3185_s28 + $0x98] sm:$0xff] }
 0x3b7   : > { %v2179_v9 = vmul.f32 %v3763_v56, %v2138_v16 }
 0x3b8   : > { %v2260_v35 = vpack.c.bf16 %v2239_v38, %v2238_v6 }
 0x3b9   : > { %v2215_v14 = vadd.f32 %v3771_v63, %v2179_v9  ;;  %v2121_v55 = vpop.f32.mrf.mxu1 }
 0x3ba   : > { %2799 = vmatmul.msk.bf16.gmra.mxu2 %vm1779_vm7, %v2260_v35  ;;  %v2172_v19 = vmul.f32 %v3763_v56, %v2121_v55  ;;  %v2920_v35 = vld [vmem:[%s3185_s28 + $0xd0] sm:$0xff] }
 0x3bb   : > { %v2247_v3 = vmax.f32 %v2215_v14, 0.0 }
 0x3bc   : > { %v2208_v21 = vadd.f32 %v3771_v63, %v2172_v19  ;;  %v2921_v19 = vld [vmem:[%s3185_s28 + $0xd8] sm:$0xff] }
 0x3bd   : > { %v2264_v59 = vpack.c.bf16 %v2247_v3, %v2246_v46 }
 0x3be   : > { %v2240_v60 = vmax.f32 %v2208_v21, 0.0 }
 0x3bf   : > { %2803 = vmatmul.msk.bf16.gmra.mxu3 %vm1779_vm7, %v2264_v59 }
 0x3c0   : > { %v2362_v41 = vpop.f32.mrf.mxu2 }
 0x3c1   : > { %v2425_v44 = vmul.f32 %v3881_v27, %v2362_v41  ;;  %v2123_v7 = vpop.f32.mrf.mxu1 }
 0x3c2   : > { %v2173_v23 = vmul.f32 %v3763_v56, %v2123_v7 }
 0x3c3   : > { %v2461_v26 = vadd.f32 %v3886_v50, %v2425_v44 }
 0x3c4   : > { %v2209_v25 = vadd.f32 %v3771_v63, %v2173_v23 }
 0x3c5   : > { %v2493_v45 = vadd.f32 %v2914_v2, %v2461_v26  ;;  %v2922_v26 = vld [vmem:[%s3185_s28 + $0xa0] sm:$0xff] }
 0x3c6   : > { %v2241_v53 = vmax.f32 %v2209_v25, 0.0 }
 0x3c7   : > { %v2525_v48 = vmax.f32 %v2493_v45, 0.0 }
 0x3c8   : > { %v2364_v12 = vpop.f32.mrf.mxu2  ;;  %v2261_v0 = vpack.c.bf16 %v2241_v53, %v2240_v60 }
 0x3c9   : > { %2557 = vst.msk [vmem:[%s3899_s15 + $0x70] sm:$0xff] %vm437_vm0, %v2525_v48  ;;  %v2426_v29 = vmul.f32 %v3881_v27, %v2364_v12 }
 0x3ca   : > { %2800 = vmatmul.msk.bf16.gmra.mxu2 %vm1779_vm7, %v2261_v0  ;;  %v2923_v0 = vld [vmem:[%s3185_s28 + $0xe0] sm:$0xff] }
 0x3cb   : > { %v2462_v18 = vadd.f32 %v3886_v50, %v2426_v29 }
 0x3cd   : > { %v2494_v31 = vadd.f32 %v2915_v5, %v2462_v18 }
 0x3cf   : > { %v2526_v32 = vmax.f32 %v2494_v31, 0.0  ;;  %v2924_v31 = vld [vmem:[%s3185_s28 + $0xa8] sm:$0xff] }
 0x3d1   : > { %2558 = vst.msk [vmem:[%s3899_s15 + $0x78] sm:$0xff] %vm437_vm0, %v2526_v32 }
 0x3da   : > { %2801 = vmatmul.msk.bf16.gmra.mxu2 %vm1779_vm7, %v4003_v20 }
 0x3df   : > { %v2141_v33 = vpop.f32.mrf.mxu3 }
 0x3e0   : > { %v2180_v13 = vmul.f32 %v3763_v56, %v2141_v33 }
 0x3e2   : > { %v2367_v34 = vpop.f32.mrf.mxu2  ;;  %v2216_v43 = vadd.f32 %v3771_v63, %v2180_v13 }
 0x3e3   : > { %v2427_v36 = vmul.f32 %v3881_v27, %v2367_v34 }
 0x3e4   : > { %v2248_v58 = vmax.f32 %v2216_v43, 0.0 }
 0x3e5   : > { %v2463_v37 = vadd.f32 %v3886_v50, %v2427_v36 }
 0x3e7   : > { %v2495_v40 = vadd.f32 %v2916_v28, %v2463_v37  ;;  %v2143_v30 = vpop.f32.mrf.mxu3 }
 0x3e8   : > { %v2181_v47 = vmul.f32 %v3763_v56, %v2143_v30 }
 0x3e9   : > { %v2527_v49 = vmax.f32 %v2495_v40, 0.0  ;;  %v2925_v40 = vld [vmem:[%s3185_s28 + $0xe8] sm:$0xff] }
 0x3ea   : > { %v2217_v20 = vadd.f32 %v3771_v63, %v2181_v47  ;;  %v2369_v57 = vpop.f32.mrf.mxu2 }
 0x3eb   : > { %2559 = vst.msk [vmem:[%s3899_s15 + $0x80] sm:$0xff] %vm437_vm0, %v2527_v49  ;;  %v2428_v42 = vmul.f32 %v3881_v27, %v2369_v57  ;;  %v2926_v49 = vld [vmem:[%s3185_s28 + $0xb0] sm:$0xff] }
 0x3ec   : > { %v2249_v39 = vmax.f32 %v2217_v20, 0.0 }
 0x3ed   : > { %v2464_v15 = vadd.f32 %v3886_v50, %v2428_v42 }
 0x3ee   : > { %v2265_v24 = vpack.c.bf16 %v2249_v39, %v2248_v58 }
 0x3ef   : > { %v2496_v52 = vadd.f32 %v2917_v51, %v2464_v15  ;;  %v2927_v15 = vld [vmem:[%s3185_s28 + $0xb8] sm:$0xff] }
 0x3f0   : > { %2804 = vmatmul.msk.bf16.gmra.mxu3 %vm1779_vm7, %v2265_v24 }
 0x3f1   : > { %v2528_v56 = vmax.f32 %v2496_v52, 0.0 }
 0x3f3   : > { %2560 = vst.msk [vmem:[%s3899_s15 + $0x88] sm:$0xff] %vm437_vm0, %v2528_v56 }
 0x3f8   : > { %v2372_v63 = vpop.f32.mrf.mxu2 }
 0x3f9   : > { %v2429_v54 = vmul.f32 %v3881_v27, %v2372_v63 }
 0x3fb   : > { %v2465_v61 = vadd.f32 %v3886_v50, %v2429_v54  ;;  %v2928_v54 = vld [vmem:[%s3185_s28 + $0xc0] sm:$0xff] }
 0x3fd   : > { %v2497_v17 = vadd.f32 %v2918_v62, %v2465_v61 }
 0x3ff   : > { %v2529_v1 = vmax.f32 %v2497_v17, 0.0 }
 0x400   : > { %v2374_v11 = vpop.f32.mrf.mxu2 }
 0x401   : > { %2561 = vst.msk [vmem:[%s3899_s15 + $0x90] sm:$0xff] %vm437_vm0, %v2529_v1  ;;  %v2430_v10 = vmul.f32 %v3881_v27, %v2374_v11 }
 0x403   : > { %v2466_v22 = vadd.f32 %v3886_v50, %v2430_v10  ;;  %v2929_v10 = vld [vmem:[%s3185_s28 + $0xc8] sm:$0xff] }
 0x405   : > { %v2498_v6 = vadd.f32 %v2919_v4, %v2466_v22 }
 0x407   : > { %v2530_v38 = vmax.f32 %v2498_v6, 0.0 }
 0x409   : > { %2562 = vst.msk [vmem:[%s3899_s15 + $0x98] sm:$0xff] %vm437_vm0, %v2530_v38 }
 0x40f   : > { %v2392_v16 = vpop.f32.mrf.mxu3 }
 0x410   : > { %v2437_v8 = vmul.f32 %v3881_v27, %v2392_v16 }
 0x412   : > { %v2473_v9 = vadd.f32 %v3886_v50, %v2437_v8  ;;  %v2930_v8 = vld [vmem:[%s3185_s28 + $0xf0] sm:$0xff] }
 0x414   : > { %v2505_v14 = vadd.f32 %v2920_v35, %v2473_v9 }
 0x416   : > { %v2537_v55 = vmax.f32 %v2505_v14, 0.0 }
 0x417   : > { %v2394_v46 = vpop.f32.mrf.mxu3 }
 0x418   : > { %2569 = vst.msk [vmem:[%s3899_s15 + $0xd0] sm:$0xff] %vm437_vm0, %v2537_v55  ;;  %v2438_v3 = vmul.f32 %v3881_v27, %v2394_v46 }
 0x41a   : > { %v2474_v59 = vadd.f32 %v3886_v50, %v2438_v3  ;;  %v2931_v3 = vld [vmem:[%s3185_s28 + $0xf8] sm:$0xff] }
 0x41c   : > { %v2506_v41 = vadd.f32 %v2921_v19, %v2474_v59 }
 0x41e   : > { %v2538_v44 = vmax.f32 %v2506_v41, 0.0 }
 0x420   : > { %2570 = vst.msk [vmem:[%s3899_s15 + $0xd8] sm:$0xff] %vm437_vm0, %v2538_v44 }
 0x43d   : > { %v2377_v7 = vpop.f32.mrf.mxu2 }
 0x43e   : > { %v2431_v21 = vmul.f32 %v3881_v27, %v2377_v7 }
 0x440   : > { %v2467_v23 = vadd.f32 %v3886_v50, %v2431_v21 }
 0x442   : > { %v2499_v25 = vadd.f32 %v2922_v26, %v2467_v23  ;;  %v2397_v2 = vpop.f32.mrf.mxu3 }
 0x443   : > { %v2439_v45 = vmul.f32 %v3881_v27, %v2397_v2 }
 0x444   : > { %v2531_v60 = vmax.f32 %v2499_v25, 0.0 }
 0x445   : > { %v2475_v53 = vadd.f32 %v3886_v50, %v2439_v45  ;;  %v2379_v48 = vpop.f32.mrf.mxu2 }
 0x446   : > { %2563 = vst.msk [vmem:[%s3899_s15 + $0xa0] sm:$0xff] %vm437_vm0, %v2531_v60  ;;  %v2432_v12 = vmul.f32 %v3881_v27, %v2379_v48 }
 0x447   : > { %v2507_v29 = vadd.f32 %v2923_v0, %v2475_v53 }
 0x448   : > { %v2468_v18 = vadd.f32 %v3886_v50, %v2432_v12 }
 0x449   : > { %v2539_v5 = vmax.f32 %v2507_v29, 0.0 }
 0x44a   : > { %v2500_v32 = vadd.f32 %v2924_v31, %v2468_v18  ;;  %v2399_v33 = vpop.f32.mrf.mxu3 }
 0x44b   : > { %2571 = vst.msk [vmem:[%s3899_s15 + $0xe0] sm:$0xff] %vm437_vm0, %v2539_v5  ;;  %v2440_v34 = vmul.f32 %v3881_v27, %v2399_v33 }
 0x44c   : > { %v2532_v36 = vmax.f32 %v2500_v32, 0.0 }
 0x44d   : > { %v2476_v13 = vadd.f32 %v3886_v50, %v2440_v34  ;;  %v2382_v37 = vpop.f32.mrf.mxu2 }
 0x44e   : > { %2564 = vst.msk [vmem:[%s3899_s15 + $0xa8] sm:$0xff] %vm437_vm0, %v2532_v36  ;;  %v2433_v28 = vmul.f32 %v3881_v27, %v2382_v37 }
 0x44f   : > { %v2508_v30 = vadd.f32 %v2925_v40, %v2476_v13 }
 0x450   : > { %v2469_v43 = vadd.f32 %v3886_v50, %v2433_v28 }
 0x451   : > { %v2540_v47 = vmax.f32 %v2508_v30, 0.0 }
 0x452   : > { %v2501_v20 = vadd.f32 %v2926_v49, %v2469_v43 }
 0x453   : > { %2572 = vst.msk [vmem:[%s3899_s15 + $0xe8] sm:$0xff] %vm437_vm0, %v2540_v47 }
 0x454   : > { %v2533_v57 = vmax.f32 %v2501_v20, 0.0 }
 0x455   : > { %v2384_v42 = vpop.f32.mrf.mxu2 }
 0x456   : > { %2565 = vst.msk [vmem:[%s3899_s15 + $0xb0] sm:$0xff] %vm437_vm0, %v2533_v57  ;;  %v2434_v58 = vmul.f32 %v3881_v27, %v2384_v42 }
 0x458   : > { %v2470_v39 = vadd.f32 %v3886_v50, %v2434_v58 }
 0x45a   : > { %v2502_v24 = vadd.f32 %v2927_v15, %v2470_v39 }
 0x45c   : > { %v2534_v51 = vmax.f32 %v2502_v24, 0.0 }
 0x45d   : > { %v2387_v52 = vpop.f32.mrf.mxu2 }
 0x45e   : > { %2566 = vst.msk [vmem:[%s3899_s15 + $0xb8] sm:$0xff] %vm437_vm0, %v2534_v51  ;;  %v2435_v56 = vmul.f32 %v3881_v27, %v2387_v52 }
 0x460   : > { %v2471_v63 = vadd.f32 %v3886_v50, %v2435_v56 }
 0x462   : > { %v2503_v61 = vadd.f32 %v2928_v54, %v2471_v63 }
 0x464   : > { %v2535_v62 = vmax.f32 %v2503_v61, 0.0 }
 0x465   : > { %v2389_v17 = vpop.f32.mrf.mxu2 }
 0x466   : > { %2567 = vst.msk [vmem:[%s3899_s15 + $0xc0] sm:$0xff] %vm437_vm0, %v2535_v62  ;;  %v2436_v1 = vmul.f32 %v3881_v27, %v2389_v17 }
 0x468   : > { %v2472_v11 = vadd.f32 %v3886_v50, %v2436_v1 }
 0x46a   : > { %v2504_v22 = vadd.f32 %v2929_v10, %v2472_v11 }
 0x46c   : > { %v2536_v4 = vmax.f32 %v2504_v22, 0.0 }
 0x46e   : > { %2568 = vst.msk [vmem:[%s3899_s15 + $0xc8] sm:$0xff] %vm437_vm0, %v2536_v4 }
 0x473   : > { %v2402_v6 = vpop.f32.mrf.mxu3 }
 0x474   : > { %v2441_v38 = vmul.f32 %v3881_v27, %v2402_v6 }
 0x476   : > { %v2477_v16 = vadd.f32 %v3886_v50, %v2441_v38 }
 0x478   : > { %v2509_v9 = vadd.f32 %v2930_v8, %v2477_v16 }
 0x47a   : > { %v2541_v35 = vmax.f32 %v2509_v9, 0.0 }
 0x47b   : > { %v2404_v14 = vpop.f32.mrf.mxu3 }
 0x47c   : > { %2573 = vst.msk [vmem:[%s3899_s15 + $0xf0] sm:$0xff] %vm437_vm0, %v2541_v35  ;;  %v2442_v55 = vmul.f32 %v3881_v27, %v2404_v14 }
 0x47e   : > { %v2478_v46 = vadd.f32 %v3886_v50, %v2442_v55 }
 0x480   : > { %v2510_v59 = vadd.f32 %v2931_v3, %v2478_v46 }
 0x482   : > { %v2542_v19 = vmax.f32 %v2510_v59, 0.0 }
 0x484   : > { %2574 = vst.msk [vmem:[%s3899_s15 + $0xf8] sm:$0xff] %vm437_vm0, %v2542_v19 }
 0x485   : > { %2989 = shalt.err (!%p2986_p4)
}
 0x486   : > { %s3037_s18 = smov 128  }
 0x487   : > { %2840 = dma.vmem_to_hbm [thread:$0]  (%p3143_p11), %s2589_s20, 4096, %s2591_s21, %s2576_s17, %s3037_s18, %s3037_s18, %s3032_s23  }
 0x488 PF: > { %s2605_s27 = sand.u32 1, %s3016_s13   ;;  %p4204_p7 = scmp.ge.s32.totalorder %s3028_s16, 2 }
 0x489   : > { %s2606_s22 = scalar_lea.sflag [#allocation5], %s2605_s27 }
 0x48a   : > { %p2847_p5 = pnand %p4204_p7, %p3147_p12 }
 0x48c   : > { %p2848_p8 = pneg %p2847_p5 }
 0x48e   : > { %3011 = dma.done.wait (%p2848_p8), %s2606_s22, 4096  }
 0x48f   : > { %3013 = vsyncadd (%p2848_p8), %s2606_s22, 4294963200  ;;  %s4205_s16 = sld [smem:[#allocation10_spill]]  ;;  %s4208_s13 = smov %s3020_s14 }
 0x490   : > { %s4206_s24 = sld [smem:[#allocation9_spill]] }
 0x491   : > { %s4207_s15 = sld [smem:[#allocation11_spill]] }
 0x495   : > { %p23_p10 = scmp.ge.s32.totalorder %s4205_s16, 4  }
 0x496   : > { %s4209_s14 = smov %s4206_s24 }
 0x497   :  { %25 = sbr.rel (!%p23_p10) target bundleno = 5 (0x5), region = 107 }
 0x49c   :  { %2612 = vsyncpa [#allocation4], 1 }
 0x49d   :  { %2614 = vsyncpa [#allocation4 + $0x1], 1 }
 0x49e   :  { %2615 = vsyncpa [#allocation5], 1 }
 0x49f   :  { %2617 = vsyncpa [#allocation5 + $0x1], 1 }

</bundles_post_ra>
